<compile_context>
chip_gen: v5e
topology: v5e:2x2
jax: 0.10.0
libtpu: 0.0.40
codegen_flags: <defaults>
</compile_context>

<pallas_src>
import functools

import jax
import jax.numpy as jnp
from jax.experimental import pallas as pl
from jax.experimental.pallas import tpu as pltpu

# ---- configuration (stand-ins for args.*) ----------------------------------
HIDDEN_LAYER_SIZE = 32
N_LAYER = 2
GAUSSIAN_MIX_NUM = 4
IN_CHANNELS = 3                                  # e.g. (dx, dy, pen) strokes
OUT_CHANNELS = 6 * GAUSSIAN_MIX_NUM + 1          # m1,m2,ls1,ls2,rho,pi (M each) + e (1)
BATCH_SIZE = 2
SEQ_LEN = 8


# ---------------------------------------------------------------------------
# Pallas kernel: the whole sequence in one invocation (no grid).
# refs = (x, h0, c0, [w_ih_l, w_hh_l, b_l]*L, w_out, b_out, y, hn, cn, seq_scr)
# ---------------------------------------------------------------------------
def _lstm_mdn_kernel(n_layer, hidden, seq_len, batch, mix, *refs):
    H, T, B = hidden, seq_len, batch
    n_in = 3 + 3 * n_layer + 2

    x_ref, h0_ref, c0_ref = refs[0:3]
    layer_refs = refs[3:3 + 3 * n_layer]
    w_out_ref = refs[3 + 3 * n_layer]
    b_out_ref = refs[4 + 3 * n_layer]
    y_ref, hn_ref, cn_ref = refs[n_in:n_in + 3]
    seq_scr = refs[n_in + 3]                      # VMEM scratch (B*T, H)

    # --- hoisted constants (built once, reused across the 16-cell unroll) ----
    lane = jax.lax.broadcasted_iota(jnp.int32, (B, 4 * H), 1)
    g_mask = (lane >= 2 * H) & (lane < 3 * H)     # 'g' gate (tanh) region; gates = i,f,g,o
    # sigmoid(x) = 0.5 * tanh(0.5 * x) + 0.5  ->  single EUP push for all four gates.
    g_scale = jnp.where(g_mask, 1.0, 0.5).astype(jnp.float32)
    g_shift = jnp.where(g_mask, 0.0, 0.5).astype(jnp.float32)

    # Recurrent weights loaded once (register/VMEM resident, ~50 KB total).
    W_ih = [layer_refs[3 * l + 0][...] for l in range(n_layer)]   # (in_l, 4H)
    W_hh = [layer_refs[3 * l + 1][...] for l in range(n_layer)]   # (H, 4H)
    # Hoisted bias broadcasts (JAX does not CSE broadcast_in_dim inside the unroll).
    Bb = [jnp.broadcast_to(layer_refs[3 * l + 2][...], (B, 4 * H))
          for l in range(n_layer)]

    # --- layer-0 input projection, hoisted OFF the recurrent chain -----------
    # Independent of h, so these MXU pushes + bias adds overlap with everything.
    xp = [jnp.dot(x_ref[:, t, :], W_ih[0],
                  preferred_element_type=jnp.float32) + Bb[0]
          for t in range(T)]                      # T x (B, 4H)

    hs = [h0_ref[l] for l in range(n_layer)]      # (B, H) each
    cs = [c0_ref[l] for l in range(n_layer)]

    # Static unroll over time and layers (T, L tiny & compile-time fixed).
    for t in range(T):
        for l in range(n_layer):
            if l == 0:
                gates = xp[t] + jnp.dot(hs[0], W_hh[0],
                                        preferred_element_type=jnp.float32)
            else:
                gates = (jnp.dot(hs[l - 1], W_ih[l],
                                 preferred_element_type=jnp.float32)
                         + jnp.dot(hs[l], W_hh[l],
                                   preferred_element_type=jnp.float32)
                         + Bb[l])

            # Single-tanh activation for all four gates (i, f, g, o).
            act = jnp.tanh(gates * g_scale) * g_scale + g_shift
            i_g = act[:, 0 * H:1 * H]
            f_g = act[:, 1 * H:2 * H]
            g_g = act[:, 2 * H:3 * H]
            o_g = act[:, 3 * H:4 * H]

            c_new = f_g * cs[l] + i_g * g_g
            h_new = o_g * jnp.tanh(c_new)
            cs[l] = c_new
            hs[l] = h_new

        # Store the last layer's hidden state in batch-first row order
        # (row b*T + t) via a strided sublane store: rows {t, t+T, ...}.
        seq_scr[pl.ds(t, B, stride=T), :] = hs[n_layer - 1]

    # Final hidden/cell state written exactly once.
    for l in range(n_layer):
        hn_ref[l] = hs[l]
        cn_ref[l] = cs[l]

    # --- head: one dense matmul over all B*T rows, tanh(rho) folded in -------
    w_out = w_out_ref[...]                        # (H, OUT) -- loaded post-loop
    b_out = b_out_ref[...]                        # (1, OUT)
    head = jnp.dot(seq_scr[...], w_out,
                   preferred_element_type=jnp.float32) + b_out   # (B*T, OUT)

    out_ch = y_ref.shape[-1]
    lane_o = jax.lax.broadcasted_iota(jnp.int32, (B * T, out_ch), 1)
    rho_mask = (lane_o >= 4 * mix) & (lane_o < 5 * mix)
    y_ref[...] = jnp.where(rho_mask, jnp.tanh(head), head)


# ---------------------------------------------------------------------------
# Wrapper: one pallas_call; only column splits remain outside (fused under jit).
# ---------------------------------------------------------------------------
@jax.jit
def uncon_gen_forward(x, state_value_hidden, params):
    """x: (B, T, C_in) float32;  state_value_hidden = (h0, c0), each (L, B, H)."""
    h0, c0 = state_value_hidden
    B, T, _ = x.shape
    L, H, M = N_LAYER, HIDDEN_LAYER_SIZE, GAUSSIAN_MIX_NUM

    flat_w = []
    for l in range(L):
        flat_w += [params[f"w_ih_{l}"], params[f"w_hh_{l}"], params[f"b_{l}"]]
    flat_w += [params["w_out"], params["b_out"]]

    n_inputs = 3 + len(flat_w)
    vmem_spec = lambda: pl.BlockSpec(memory_space=pltpu.MemorySpace.VMEM)

    out_shape = (
        jax.ShapeDtypeStruct((B * T, OUT_CHANNELS), jnp.float32),  # y, batch-first rows
        jax.ShapeDtypeStruct((L, B, H), jnp.float32),              # h_n
        jax.ShapeDtypeStruct((L, B, H), jnp.float32),              # c_n
    )

    kernel = functools.partial(_lstm_mdn_kernel, L, H, T, B, M)

    # No grid: everything (<100 KB) lives in VMEM for the single invocation.
    y, h_n, c_n = pl.pallas_call(
        kernel,
        out_shape=out_shape,
        in_specs=[vmem_spec() for _ in range(n_inputs)],
        out_specs=(vmem_spec(), vmem_spec(), vmem_spec()),
        scratch_shapes=[pltpu.VMEM((B * T, H), jnp.float32)],
    )(x, h0, c0, *flat_w)

    m1 = y[:, 0 * M:1 * M]
    m2 = y[:, 1 * M:2 * M]
    log_s1 = y[:, 2 * M:3 * M]
    log_s2 = y[:, 3 * M:4 * M]
    rho = y[:, 4 * M:5 * M]          # tanh already applied in-kernel
    pred_pi = y[:, 5 * M:6 * M]
    pred_e = y[:, 6 * M:]

    mix_dens_net_dict = {
        "m1": m1, "m2": m2, "log_s1": log_s1, "log_s2": log_s2,
        "rho": rho, "pred_pi": pred_pi,
    }
    return (h_n, c_n), mix_dens_net_dict, pred_e


# ---------------------------------------------------------------------------
# Deterministic parameter init (PyTorch-style U(-1/sqrt(H), 1/sqrt(H))).
# ---------------------------------------------------------------------------
def init_params(key):
    H = HIDDEN_LAYER_SIZE
    bound = 1.0 / (H ** 0.5)
    params = {}
    for l in range(N_LAYER):
        in_l = IN_CHANNELS if l == 0 else H
        key, k1, k2, k3, k4 = jax.random.split(key, 5)
        params[f"w_ih_{l}"] = jax.random.uniform(
            k1, (in_l, 4 * H), jnp.float32, -bound, bound)
        params[f"w_hh_{l}"] = jax.random.uniform(
            k2, (H, 4 * H), jnp.float32, -bound, bound)
        b_ih = jax.random.uniform(k3, (4 * H,), jnp.float32, -bound, bound)
        b_hh = jax.random.uniform(k4, (4 * H,), jnp.float32, -bound, bound)
        params[f"b_{l}"] = (b_ih + b_hh).reshape(1, 4 * H)
    key, k1, k2 = jax.random.split(key, 3)
    params["w_out"] = jax.random.uniform(
        k1, (H, OUT_CHANNELS), jnp.float32, -bound, bound)
    params["b_out"] = jax.random.uniform(
        k2, (1, OUT_CHANNELS), jnp.float32, -bound, bound)
    return params


# ---------------------------------------------------------------------------
# Pure-JAX reference (mirrors torch.nn.LSTM + Linear) for validation.
# ---------------------------------------------------------------------------
def reference_forward(x, h0, c0, params):
    B, T, _ = x.shape
    H = HIDDEN_LAYER_SIZE
    h = [h0[l] for l in range(N_LAYER)]
    c = [c0[l] for l in range(N_LAYER)]
    outs = []
    for t in range(T):
        inp = x[:, t, :]
        for l in range(N_LAYER):
            gates = (inp @ params[f"w_ih_{l}"]
                     + h[l] @ params[f"w_hh_{l}"]
                     + params[f"b_{l}"])
            i_g = jax.nn.sigmoid(gates[:, 0 * H:1 * H])
            f_g = jax.nn.sigmoid(gates[:, 1 * H:2 * H])
            g_g = jnp.tanh(gates[:, 2 * H:3 * H])
            o_g = jax.nn.sigmoid(gates[:, 3 * H:4 * H])
            c[l] = f_g * c[l] + i_g * g_g
            h[l] = o_g * jnp.tanh(c[l])
            inp = h[l]
        outs.append(inp)
    seq = jnp.stack(outs, axis=1).reshape(B * T, H)
    out = seq @ params["w_out"] + params["b_out"]
    return jnp.stack(h), jnp.stack(c), out


def state_values_inits():
    h = jnp.zeros((N_LAYER, BATCH_SIZE, HIDDEN_LAYER_SIZE), jnp.float32)
    c = jnp.zeros((N_LAYER, BATCH_SIZE, HIDDEN_LAYER_SIZE), jnp.float32)
    return (h, c)


if __name__ == "__main__":
    key = jax.random.PRNGKey(0)
    key, kx, kp = jax.random.split(key, 3)

    x = jax.random.normal(kx, (BATCH_SIZE, SEQ_LEN, IN_CHANNELS), jnp.float32)
    params = init_params(kp)
    h0, c0 = state_values_inits()

    (h_n, c_n), mdn, pred_e = uncon_gen_forward(x, (h0, c0), params)
    jax.block_until_ready((h_n, c_n, mdn, pred_e))

    # sanity-check vs pure-JAX reference
    h_ref, c_ref, out_ref = reference_forward(x, h0, c0, params)
    M = GAUSSIAN_MIX_NUM
    TOL = dict(atol=1e-4, rtol=1e-4)
    assert jnp.allclose(h_n, h_ref, **TOL)
    assert jnp.allclose(c_n, c_ref, **TOL)
    assert jnp.allclose(mdn["m1"], out_ref[:, 0 * M:1 * M], **TOL)
    assert jnp.allclose(mdn["m2"], out_ref[:, 1 * M:2 * M], **TOL)
    assert jnp.allclose(mdn["log_s1"], out_ref[:, 2 * M:3 * M], **TOL)
    assert jnp.allclose(mdn["log_s2"], out_ref[:, 3 * M:4 * M], **TOL)
    assert jnp.allclose(mdn["rho"], jnp.tanh(out_ref[:, 4 * M:5 * M]), **TOL)
    assert jnp.allclose(mdn["pred_pi"], out_ref[:, 5 * M:6 * M], **TOL)
    assert jnp.allclose(pred_e, out_ref[:, 6 * M:], **TOL)
    assert pred_e.shape == (BATCH_SIZE * SEQ_LEN, 1)

    print("KERNEL_OK")
</pallas_src>

<mosaic_0001>
module attributes {stable_mosaic.version = 11 : i64} {
  func.func @_lstm_mdn_kernel(%arg0: memref<2x8x3xf32, #tpu.memory_space<vmem>>, %arg1: memref<2x2x32xf32, #tpu.memory_space<vmem>>, %arg2: memref<2x2x32xf32, #tpu.memory_space<vmem>>, %arg3: memref<3x128xf32, #tpu.memory_space<vmem>>, %arg4: memref<32x128xf32, #tpu.memory_space<vmem>>, %arg5: memref<1x128xf32, #tpu.memory_space<vmem>>, %arg6: memref<32x128xf32, #tpu.memory_space<vmem>>, %arg7: memref<32x128xf32, #tpu.memory_space<vmem>>, %arg8: memref<1x128xf32, #tpu.memory_space<vmem>>, %arg9: memref<32x25xf32, #tpu.memory_space<vmem>>, %arg10: memref<1x25xf32, #tpu.memory_space<vmem>>, %arg11: memref<16x25xf32, #tpu.memory_space<vmem>>, %arg12: memref<2x2x32xf32, #tpu.memory_space<vmem>>, %arg13: memref<2x2x32xf32, #tpu.memory_space<vmem>>, %arg14: memref<16x32xf32, #tpu.memory_space<vmem>>) attributes {dimension_semantics = [], scalar_prefetch = 0 : i64, scratch_operands = 1 : i64, tpu.core_type = #tpu.core_type<tc>} {
    %0 = tpu.iota {dimensions = array<i32: 1>} : vector<2x128xi32>
    %c64_i32 = arith.constant 64 : i32
    %1 = vector.broadcast %c64_i32 : i32 to vector<2x128xi32>
    %2 = arith.cmpi sge, %0, %1 : vector<2x128xi32>
    %c96_i32 = arith.constant 96 : i32
    %3 = vector.broadcast %c96_i32 : i32 to vector<2x128xi32>
    %4 = arith.cmpi slt, %0, %3 : vector<2x128xi32>
    %5 = arith.andi %2, %4 : vector<2x128xi1>
    %cst = arith.constant 1.000000e+00 : f32
    %cst_0 = arith.constant 5.000000e-01 : f32
    %6 = vector.broadcast %cst : f32 to vector<2x128xf32>
    %7 = vector.broadcast %cst_0 : f32 to vector<2x128xf32>
    %8 = arith.select %5, %6, %7 : vector<2x128xi1>, vector<2x128xf32>
    %cst_1 = arith.constant 0.000000e+00 : f32
    %cst_2 = arith.constant 5.000000e-01 : f32
    %9 = vector.broadcast %cst_1 : f32 to vector<2x128xf32>
    %10 = vector.broadcast %cst_2 : f32 to vector<2x128xf32>
    %11 = arith.select %5, %9, %10 : vector<2x128xi1>, vector<2x128xf32>
    %c0 = arith.constant 0 : index
    %c0_3 = arith.constant 0 : index
    %12 = vector.load %arg3[%c0, %c0_3] : memref<3x128xf32, #tpu.memory_space<vmem>>, vector<3x128xf32>
    %c0_4 = arith.constant 0 : index
    %c0_5 = arith.constant 0 : index
    %13 = vector.load %arg6[%c0_4, %c0_5] : memref<32x128xf32, #tpu.memory_space<vmem>>, vector<32x128xf32>
    %c0_6 = arith.constant 0 : index
    %c0_7 = arith.constant 0 : index
    %14 = vector.load %arg4[%c0_6, %c0_7] : memref<32x128xf32, #tpu.memory_space<vmem>>, vector<32x128xf32>
    %c0_8 = arith.constant 0 : index
    %c0_9 = arith.constant 0 : index
    %15 = vector.load %arg7[%c0_8, %c0_9] : memref<32x128xf32, #tpu.memory_space<vmem>>, vector<32x128xf32>
    %c0_10 = arith.constant 0 : index
    %c0_11 = arith.constant 0 : index
    %16 = vector.load %arg5[%c0_10, %c0_11] : memref<1x128xf32, #tpu.memory_space<vmem>>, vector<1x128xf32>
    %17 = vector.shape_cast %16 : vector<1x128xf32> to vector<1x128xf32>
    %18 = vector.broadcast %17 : vector<1x128xf32> to vector<2x128xf32>
    %c0_12 = arith.constant 0 : index
    %c0_13 = arith.constant 0 : index
    %19 = vector.load %arg8[%c0_12, %c0_13] : memref<1x128xf32, #tpu.memory_space<vmem>>, vector<1x128xf32>
    %20 = vector.shape_cast %19 : vector<1x128xf32> to vector<1x128xf32>
    %21 = vector.broadcast %20 : vector<1x128xf32> to vector<2x128xf32>
    %c0_14 = arith.constant 0 : index
    %c0_15 = arith.constant 0 : index
    %c0_16 = arith.constant 0 : index
    %22 = vector.load %arg0[%c0_14, %c0_15, %c0_16] : memref<2x8x3xf32, #tpu.memory_space<vmem>>, vector<2x1x3xf32>
    %23 = vector.shape_cast %22 : vector<2x1x3xf32> to vector<2x3xf32>
    %cst_17 = arith.constant dense<0.000000e+00> : vector<2x128xf32>
    %24 = tpu.matmul %23, %12, %cst_17 {dimension_numbers = #tpu.dot_dimension_numbers<[1], [0], [0], [1], [0, 0, 1, 1], [], []>} : vector<2x3xf32>, vector<3x128xf32>, vector<2x128xf32> -> vector<2x128xf32>
    %25 = arith.addf %24, %18 : vector<2x128xf32>
    %c0_18 = arith.constant 0 : index
    %c1 = arith.constant 1 : index
    %c0_19 = arith.constant 0 : index
    %26 = vector.load %arg0[%c0_18, %c1, %c0_19] : memref<2x8x3xf32, #tpu.memory_space<vmem>>, vector<2x1x3xf32>
    %27 = vector.shape_cast %26 : vector<2x1x3xf32> to vector<2x3xf32>
    %cst_20 = arith.constant dense<0.000000e+00> : vector<2x128xf32>
    %28 = tpu.matmul %27, %12, %cst_20 {dimension_numbers = #tpu.dot_dimension_numbers<[1], [0], [0], [1], [0, 0, 1, 1], [], []>} : vector<2x3xf32>, vector<3x128xf32>, vector<2x128xf32> -> vector<2x128xf32>
    %29 = arith.addf %28, %18 : vector<2x128xf32>
    %c0_21 = arith.constant 0 : index
    %c2 = arith.constant 2 : index
    %c0_22 = arith.constant 0 : index
    %30 = vector.load %arg0[%c0_21, %c2, %c0_22] : memref<2x8x3xf32, #tpu.memory_space<vmem>>, vector<2x1x3xf32>
    %31 = vector.shape_cast %30 : vector<2x1x3xf32> to vector<2x3xf32>
    %cst_23 = arith.constant dense<0.000000e+00> : vector<2x128xf32>
    %32 = tpu.matmul %31, %12, %cst_23 {dimension_numbers = #tpu.dot_dimension_numbers<[1], [0], [0], [1], [0, 0, 1, 1], [], []>} : vector<2x3xf32>, vector<3x128xf32>, vector<2x128xf32> -> vector<2x128xf32>
    %33 = arith.addf %32, %18 : vector<2x128xf32>
    %c0_24 = arith.constant 0 : index
    %c3 = arith.constant 3 : index
    %c0_25 = arith.constant 0 : index
    %34 = vector.load %arg0[%c0_24, %c3, %c0_25] : memref<2x8x3xf32, #tpu.memory_space<vmem>>, vector<2x1x3xf32>
    %35 = vector.shape_cast %34 : vector<2x1x3xf32> to vector<2x3xf32>
    %cst_26 = arith.constant dense<0.000000e+00> : vector<2x128xf32>
    %36 = tpu.matmul %35, %12, %cst_26 {dimension_numbers = #tpu.dot_dimension_numbers<[1], [0], [0], [1], [0, 0, 1, 1], [], []>} : vector<2x3xf32>, vector<3x128xf32>, vector<2x128xf32> -> vector<2x128xf32>
    %37 = arith.addf %36, %18 : vector<2x128xf32>
    %c0_27 = arith.constant 0 : index
    %c4 = arith.constant 4 : index
    %c0_28 = arith.constant 0 : index
    %38 = vector.load %arg0[%c0_27, %c4, %c0_28] : memref<2x8x3xf32, #tpu.memory_space<vmem>>, vector<2x1x3xf32>
    %39 = vector.shape_cast %38 : vector<2x1x3xf32> to vector<2x3xf32>
    %cst_29 = arith.constant dense<0.000000e+00> : vector<2x128xf32>
    %40 = tpu.matmul %39, %12, %cst_29 {dimension_numbers = #tpu.dot_dimension_numbers<[1], [0], [0], [1], [0, 0, 1, 1], [], []>} : vector<2x3xf32>, vector<3x128xf32>, vector<2x128xf32> -> vector<2x128xf32>
    %41 = arith.addf %40, %18 : vector<2x128xf32>
    %c0_30 = arith.constant 0 : index
    %c5 = arith.constant 5 : index
    %c0_31 = arith.constant 0 : index
    %42 = vector.load %arg0[%c0_30, %c5, %c0_31] : memref<2x8x3xf32, #tpu.memory_space<vmem>>, vector<2x1x3xf32>
    %43 = vector.shape_cast %42 : vector<2x1x3xf32> to vector<2x3xf32>
    %cst_32 = arith.constant dense<0.000000e+00> : vector<2x128xf32>
    %44 = tpu.matmul %43, %12, %cst_32 {dimension_numbers = #tpu.dot_dimension_numbers<[1], [0], [0], [1], [0, 0, 1, 1], [], []>} : vector<2x3xf32>, vector<3x128xf32>, vector<2x128xf32> -> vector<2x128xf32>
    %45 = arith.addf %44, %18 : vector<2x128xf32>
    %c0_33 = arith.constant 0 : index
    %c6 = arith.constant 6 : index
    %c0_34 = arith.constant 0 : index
    %46 = vector.load %arg0[%c0_33, %c6, %c0_34] : memref<2x8x3xf32, #tpu.memory_space<vmem>>, vector<2x1x3xf32>
    %47 = vector.shape_cast %46 : vector<2x1x3xf32> to vector<2x3xf32>
    %cst_35 = arith.constant dense<0.000000e+00> : vector<2x128xf32>
    %48 = tpu.matmul %47, %12, %cst_35 {dimension_numbers = #tpu.dot_dimension_numbers<[1], [0], [0], [1], [0, 0, 1, 1], [], []>} : vector<2x3xf32>, vector<3x128xf32>, vector<2x128xf32> -> vector<2x128xf32>
    %49 = arith.addf %48, %18 : vector<2x128xf32>
    %c0_36 = arith.constant 0 : index
    %c7 = arith.constant 7 : index
    %c0_37 = arith.constant 0 : index
    %50 = vector.load %arg0[%c0_36, %c7, %c0_37] : memref<2x8x3xf32, #tpu.memory_space<vmem>>, vector<2x1x3xf32>
    %51 = vector.shape_cast %50 : vector<2x1x3xf32> to vector<2x3xf32>
    %cst_38 = arith.constant dense<0.000000e+00> : vector<2x128xf32>
    %52 = tpu.matmul %51, %12, %cst_38 {dimension_numbers = #tpu.dot_dimension_numbers<[1], [0], [0], [1], [0, 0, 1, 1], [], []>} : vector<2x3xf32>, vector<3x128xf32>, vector<2x128xf32> -> vector<2x128xf32>
    %53 = arith.addf %52, %18 : vector<2x128xf32>
    %c0_39 = arith.constant 0 : index
    %c0_40 = arith.constant 0 : index
    %c0_41 = arith.constant 0 : index
    %54 = vector.load %arg1[%c0_39, %c0_40, %c0_41] : memref<2x2x32xf32, #tpu.memory_space<vmem>>, vector<1x2x32xf32>
    %55 = vector.shape_cast %54 : vector<1x2x32xf32> to vector<2x32xf32>
    %c1_42 = arith.constant 1 : index
    %c0_43 = arith.constant 0 : index
    %c0_44 = arith.constant 0 : index
    %56 = vector.load %arg1[%c1_42, %c0_43, %c0_44] : memref<2x2x32xf32, #tpu.memory_space<vmem>>, vector<1x2x32xf32>
    %57 = vector.shape_cast %56 : vector<1x2x32xf32> to vector<2x32xf32>
    %c0_45 = arith.constant 0 : index
    %c0_46 = arith.constant 0 : index
    %c0_47 = arith.constant 0 : index
    %58 = vector.load %arg2[%c0_45, %c0_46, %c0_47] : memref<2x2x32xf32, #tpu.memory_space<vmem>>, vector<1x2x32xf32>
    %59 = vector.shape_cast %58 : vector<1x2x32xf32> to vector<2x32xf32>
    %c1_48 = arith.constant 1 : index
    %c0_49 = arith.constant 0 : index
    %c0_50 = arith.constant 0 : index
    %60 = vector.load %arg2[%c1_48, %c0_49, %c0_50] : memref<2x2x32xf32, #tpu.memory_space<vmem>>, vector<1x2x32xf32>
    %61 = vector.shape_cast %60 : vector<1x2x32xf32> to vector<2x32xf32>
    %cst_51 = arith.constant dense<0.000000e+00> : vector<2x128xf32>
    %62 = tpu.matmul %55, %14, %cst_51 {dimension_numbers = #tpu.dot_dimension_numbers<[1], [0], [0], [1], [0, 0, 1, 1], [], []>} : vector<2x32xf32>, vector<32x128xf32>, vector<2x128xf32> -> vector<2x128xf32>
    %63 = arith.addf %25, %62 : vector<2x128xf32>
    %64 = arith.mulf %63, %8 : vector<2x128xf32>
    %65 = math.tanh %64 : vector<2x128xf32>
    %66 = arith.mulf %65, %8 : vector<2x128xf32>
    %67 = arith.addf %66, %11 : vector<2x128xf32>
    %68 = vector.extract_strided_slice %67 {offsets = [0, 0], sizes = [2, 32], strides = [1, 1]} : vector<2x128xf32> to vector<2x32xf32>
    %69 = vector.extract_strided_slice %67 {offsets = [0, 32], sizes = [2, 32], strides = [1, 1]} : vector<2x128xf32> to vector<2x32xf32>
    %70 = vector.extract_strided_slice %67 {offsets = [0, 64], sizes = [2, 32], strides = [1, 1]} : vector<2x128xf32> to vector<2x32xf32>
    %71 = vector.extract_strided_slice %67 {offsets = [0, 96], sizes = [2, 32], strides = [1, 1]} : vector<2x128xf32> to vector<2x32xf32>
    %72 = arith.mulf %69, %59 : vector<2x32xf32>
    %73 = arith.mulf %68, %70 : vector<2x32xf32>
    %74 = arith.addf %72, %73 : vector<2x32xf32>
    %75 = math.tanh %74 : vector<2x32xf32>
    %76 = arith.mulf %71, %75 : vector<2x32xf32>
    %cst_52 = arith.constant dense<0.000000e+00> : vector<2x128xf32>
    %77 = tpu.matmul %76, %13, %cst_52 {dimension_numbers = #tpu.dot_dimension_numbers<[1], [0], [0], [1], [0, 0, 1, 1], [], []>} : vector<2x32xf32>, vector<32x128xf32>, vector<2x128xf32> -> vector<2x128xf32>
    %cst_53 = arith.constant dense<0.000000e+00> : vector<2x128xf32>
    %78 = tpu.matmul %57, %15, %cst_53 {dimension_numbers = #tpu.dot_dimension_numbers<[1], [0], [0], [1], [0, 0, 1, 1], [], []>} : vector<2x32xf32>, vector<32x128xf32>, vector<2x128xf32> -> vector<2x128xf32>
    %79 = arith.addf %77, %78 : vector<2x128xf32>
    %80 = arith.addf %79, %21 : vector<2x128xf32>
    %81 = arith.mulf %80, %8 : vector<2x128xf32>
    %82 = math.tanh %81 : vector<2x128xf32>
    %83 = arith.mulf %82, %8 : vector<2x128xf32>
    %84 = arith.addf %83, %11 : vector<2x128xf32>
    %85 = vector.extract_strided_slice %84 {offsets = [0, 0], sizes = [2, 32], strides = [1, 1]} : vector<2x128xf32> to vector<2x32xf32>
    %86 = vector.extract_strided_slice %84 {offsets = [0, 32], sizes = [2, 32], strides = [1, 1]} : vector<2x128xf32> to vector<2x32xf32>
    %87 = vector.extract_strided_slice %84 {offsets = [0, 64], sizes = [2, 32], strides = [1, 1]} : vector<2x128xf32> to vector<2x32xf32>
    %88 = vector.extract_strided_slice %84 {offsets = [0, 96], sizes = [2, 32], strides = [1, 1]} : vector<2x128xf32> to vector<2x32xf32>
    %89 = arith.mulf %86, %61 : vector<2x32xf32>
    %90 = arith.mulf %85, %87 : vector<2x32xf32>
    %91 = arith.addf %89, %90 : vector<2x32xf32>
    %92 = math.tanh %91 : vector<2x32xf32>
    %93 = arith.mulf %88, %92 : vector<2x32xf32>
    %c0_54 = arith.constant 0 : index
    %c0_55 = arith.constant 0 : index
    %94 = tpu.strided_load %arg14[%c0_54, %c0_55] {strides = array<i32: 8, 1>} : memref<16x32xf32, #tpu.memory_space<vmem>>, vector<2x32xf32>
    tpu.strided_store %arg14[%c0_54, %c0_55], %93 {strides = array<i32: 8, 1>} : memref<16x32xf32, #tpu.memory_space<vmem>>, vector<2x32xf32>
    %cst_56 = arith.constant dense<0.000000e+00> : vector<2x128xf32>
    %95 = tpu.matmul %76, %14, %cst_56 {dimension_numbers = #tpu.dot_dimension_numbers<[1], [0], [0], [1], [0, 0, 1, 1], [], []>} : vector<2x32xf32>, vector<32x128xf32>, vector<2x128xf32> -> vector<2x128xf32>
    %96 = arith.addf %29, %95 : vector<2x128xf32>
    %97 = arith.mulf %96, %8 : vector<2x128xf32>
    %98 = math.tanh %97 : vector<2x128xf32>
    %99 = arith.mulf %98, %8 : vector<2x128xf32>
    %100 = arith.addf %99, %11 : vector<2x128xf32>
    %101 = vector.extract_strided_slice %100 {offsets = [0, 0], sizes = [2, 32], strides = [1, 1]} : vector<2x128xf32> to vector<2x32xf32>
    %102 = vector.extract_strided_slice %100 {offsets = [0, 32], sizes = [2, 32], strides = [1, 1]} : vector<2x128xf32> to vector<2x32xf32>
    %103 = vector.extract_strided_slice %100 {offsets = [0, 64], sizes = [2, 32], strides = [1, 1]} : vector<2x128xf32> to vector<2x32xf32>
    %104 = vector.extract_strided_slice %100 {offsets = [0, 96], sizes = [2, 32], strides = [1, 1]} : vector<2x128xf32> to vector<2x32xf32>
    %105 = arith.mulf %102, %74 : vector<2x32xf32>
    %106 = arith.mulf %101, %103 : vector<2x32xf32>
    %107 = arith.addf %105, %106 : vector<2x32xf32>
    %108 = math.tanh %107 : vector<2x32xf32>
    %109 = arith.mulf %104, %108 : vector<2x32xf32>
    %cst_57 = arith.constant dense<0.000000e+00> : vector<2x128xf32>
    %110 = tpu.matmul %109, %13, %cst_57 {dimension_numbers = #tpu.dot_dimension_numbers<[1], [0], [0], [1], [0, 0, 1, 1], [], []>} : vector<2x32xf32>, vector<32x128xf32>, vector<2x128xf32> -> vector<2x128xf32>
    %cst_58 = arith.constant dense<0.000000e+00> : vector<2x128xf32>
    %111 = tpu.matmul %93, %15, %cst_58 {dimension_numbers = #tpu.dot_dimension_numbers<[1], [0], [0], [1], [0, 0, 1, 1], [], []>} : vector<2x32xf32>, vector<32x128xf32>, vector<2x128xf32> -> vector<2x128xf32>
    %112 = arith.addf %110, %111 : vector<2x128xf32>
    %113 = arith.addf %112, %21 : vector<2x128xf32>
    %114 = arith.mulf %113, %8 : vector<2x128xf32>
    %115 = math.tanh %114 : vector<2x128xf32>
    %116 = arith.mulf %115, %8 : vector<2x128xf32>
    %117 = arith.addf %116, %11 : vector<2x128xf32>
    %118 = vector.extract_strided_slice %117 {offsets = [0, 0], sizes = [2, 32], strides = [1, 1]} : vector<2x128xf32> to vector<2x32xf32>
    %119 = vector.extract_strided_slice %117 {offsets = [0, 32], sizes = [2, 32], strides = [1, 1]} : vector<2x128xf32> to vector<2x32xf32>
    %120 = vector.extract_strided_slice %117 {offsets = [0, 64], sizes = [2, 32], strides = [1, 1]} : vector<2x128xf32> to vector<2x32xf32>
    %121 = vector.extract_strided_slice %117 {offsets = [0, 96], sizes = [2, 32], strides = [1, 1]} : vector<2x128xf32> to vector<2x32xf32>
    %122 = arith.mulf %119, %91 : vector<2x32xf32>
    %123 = arith.mulf %118, %120 : vector<2x32xf32>
    %124 = arith.addf %122, %123 : vector<2x32xf32>
    %125 = math.tanh %124 : vector<2x32xf32>
    %126 = arith.mulf %121, %125 : vector<2x32xf32>
    %c1_59 = arith.constant 1 : index
    %c0_60 = arith.constant 0 : index
    %127 = tpu.strided_load %arg14[%c1_59, %c0_60] {strides = array<i32: 8, 1>} : memref<16x32xf32, #tpu.memory_space<vmem>>, vector<2x32xf32>
    tpu.strided_store %arg14[%c1_59, %c0_60], %126 {strides = array<i32: 8, 1>} : memref<16x32xf32, #tpu.memory_space<vmem>>, vector<2x32xf32>
    %cst_61 = arith.constant dense<0.000000e+00> : vector<2x128xf32>
    %128 = tpu.matmul %109, %14, %cst_61 {dimension_numbers = #tpu.dot_dimension_numbers<[1], [0], [0], [1], [0, 0, 1, 1], [], []>} : vector<2x32xf32>, vector<32x128xf32>, vector<2x128xf32> -> vector<2x128xf32>
    %129 = arith.addf %33, %128 : vector<2x128xf32>
    %130 = arith.mulf %129, %8 : vector<2x128xf32>
    %131 = math.tanh %130 : vector<2x128xf32>
    %132 = arith.mulf %131, %8 : vector<2x128xf32>
    %133 = arith.addf %132, %11 : vector<2x128xf32>
    %134 = vector.extract_strided_slice %133 {offsets = [0, 0], sizes = [2, 32], strides = [1, 1]} : vector<2x128xf32> to vector<2x32xf32>
    %135 = vector.extract_strided_slice %133 {offsets = [0, 32], sizes = [2, 32], strides = [1, 1]} : vector<2x128xf32> to vector<2x32xf32>
    %136 = vector.extract_strided_slice %133 {offsets = [0, 64], sizes = [2, 32], strides = [1, 1]} : vector<2x128xf32> to vector<2x32xf32>
    %137 = vector.extract_strided_slice %133 {offsets = [0, 96], sizes = [2, 32], strides = [1, 1]} : vector<2x128xf32> to vector<2x32xf32>
    %138 = arith.mulf %135, %107 : vector<2x32xf32>
    %139 = arith.mulf %134, %136 : vector<2x32xf32>
    %140 = arith.addf %138, %139 : vector<2x32xf32>
    %141 = math.tanh %140 : vector<2x32xf32>
    %142 = arith.mulf %137, %141 : vector<2x32xf32>
    %cst_62 = arith.constant dense<0.000000e+00> : vector<2x128xf32>
    %143 = tpu.matmul %142, %13, %cst_62 {dimension_numbers = #tpu.dot_dimension_numbers<[1], [0], [0], [1], [0, 0, 1, 1], [], []>} : vector<2x32xf32>, vector<32x128xf32>, vector<2x128xf32> -> vector<2x128xf32>
    %cst_63 = arith.constant dense<0.000000e+00> : vector<2x128xf32>
    %144 = tpu.matmul %126, %15, %cst_63 {dimension_numbers = #tpu.dot_dimension_numbers<[1], [0], [0], [1], [0, 0, 1, 1], [], []>} : vector<2x32xf32>, vector<32x128xf32>, vector<2x128xf32> -> vector<2x128xf32>
    %145 = arith.addf %143, %144 : vector<2x128xf32>
    %146 = arith.addf %145, %21 : vector<2x128xf32>
    %147 = arith.mulf %146, %8 : vector<2x128xf32>
    %148 = math.tanh %147 : vector<2x128xf32>
    %149 = arith.mulf %148, %8 : vector<2x128xf32>
    %150 = arith.addf %149, %11 : vector<2x128xf32>
    %151 = vector.extract_strided_slice %150 {offsets = [0, 0], sizes = [2, 32], strides = [1, 1]} : vector<2x128xf32> to vector<2x32xf32>
    %152 = vector.extract_strided_slice %150 {offsets = [0, 32], sizes = [2, 32], strides = [1, 1]} : vector<2x128xf32> to vector<2x32xf32>
    %153 = vector.extract_strided_slice %150 {offsets = [0, 64], sizes = [2, 32], strides = [1, 1]} : vector<2x128xf32> to vector<2x32xf32>
    %154 = vector.extract_strided_slice %150 {offsets = [0, 96], sizes = [2, 32], strides = [1, 1]} : vector<2x128xf32> to vector<2x32xf32>
    %155 = arith.mulf %152, %124 : vector<2x32xf32>
    %156 = arith.mulf %151, %153 : vector<2x32xf32>
    %157 = arith.addf %155, %156 : vector<2x32xf32>
    %158 = math.tanh %157 : vector<2x32xf32>
    %159 = arith.mulf %154, %158 : vector<2x32xf32>
    %c2_64 = arith.constant 2 : index
    %c0_65 = arith.constant 0 : index
    %160 = tpu.strided_load %arg14[%c2_64, %c0_65] {strides = array<i32: 8, 1>} : memref<16x32xf32, #tpu.memory_space<vmem>>, vector<2x32xf32>
    tpu.strided_store %arg14[%c2_64, %c0_65], %159 {strides = array<i32: 8, 1>} : memref<16x32xf32, #tpu.memory_space<vmem>>, vector<2x32xf32>
    %cst_66 = arith.constant dense<0.000000e+00> : vector<2x128xf32>
    %161 = tpu.matmul %142, %14, %cst_66 {dimension_numbers = #tpu.dot_dimension_numbers<[1], [0], [0], [1], [0, 0, 1, 1], [], []>} : vector<2x32xf32>, vector<32x128xf32>, vector<2x128xf32> -> vector<2x128xf32>
    %162 = arith.addf %37, %161 : vector<2x128xf32>
    %163 = arith.mulf %162, %8 : vector<2x128xf32>
    %164 = math.tanh %163 : vector<2x128xf32>
    %165 = arith.mulf %164, %8 : vector<2x128xf32>
    %166 = arith.addf %165, %11 : vector<2x128xf32>
    %167 = vector.extract_strided_slice %166 {offsets = [0, 0], sizes = [2, 32], strides = [1, 1]} : vector<2x128xf32> to vector<2x32xf32>
    %168 = vector.extract_strided_slice %166 {offsets = [0, 32], sizes = [2, 32], strides = [1, 1]} : vector<2x128xf32> to vector<2x32xf32>
    %169 = vector.extract_strided_slice %166 {offsets = [0, 64], sizes = [2, 32], strides = [1, 1]} : vector<2x128xf32> to vector<2x32xf32>
    %170 = vector.extract_strided_slice %166 {offsets = [0, 96], sizes = [2, 32], strides = [1, 1]} : vector<2x128xf32> to vector<2x32xf32>
    %171 = arith.mulf %168, %140 : vector<2x32xf32>
    %172 = arith.mulf %167, %169 : vector<2x32xf32>
    %173 = arith.addf %171, %172 : vector<2x32xf32>
    %174 = math.tanh %173 : vector<2x32xf32>
    %175 = arith.mulf %170, %174 : vector<2x32xf32>
    %cst_67 = arith.constant dense<0.000000e+00> : vector<2x128xf32>
    %176 = tpu.matmul %175, %13, %cst_67 {dimension_numbers = #tpu.dot_dimension_numbers<[1], [0], [0], [1], [0, 0, 1, 1], [], []>} : vector<2x32xf32>, vector<32x128xf32>, vector<2x128xf32> -> vector<2x128xf32>
    %cst_68 = arith.constant dense<0.000000e+00> : vector<2x128xf32>
    %177 = tpu.matmul %159, %15, %cst_68 {dimension_numbers = #tpu.dot_dimension_numbers<[1], [0], [0], [1], [0, 0, 1, 1], [], []>} : vector<2x32xf32>, vector<32x128xf32>, vector<2x128xf32> -> vector<2x128xf32>
    %178 = arith.addf %176, %177 : vector<2x128xf32>
    %179 = arith.addf %178, %21 : vector<2x128xf32>
    %180 = arith.mulf %179, %8 : vector<2x128xf32>
    %181 = math.tanh %180 : vector<2x128xf32>
    %182 = arith.mulf %181, %8 : vector<2x128xf32>
    %183 = arith.addf %182, %11 : vector<2x128xf32>
    %184 = vector.extract_strided_slice %183 {offsets = [0, 0], sizes = [2, 32], strides = [1, 1]} : vector<2x128xf32> to vector<2x32xf32>
    %185 = vector.extract_strided_slice %183 {offsets = [0, 32], sizes = [2, 32], strides = [1, 1]} : vector<2x128xf32> to vector<2x32xf32>
    %186 = vector.extract_strided_slice %183 {offsets = [0, 64], sizes = [2, 32], strides = [1, 1]} : vector<2x128xf32> to vector<2x32xf32>
    %187 = vector.extract_strided_slice %183 {offsets = [0, 96], sizes = [2, 32], strides = [1, 1]} : vector<2x128xf32> to vector<2x32xf32>
    %188 = arith.mulf %185, %157 : vector<2x32xf32>
    %189 = arith.mulf %184, %186 : vector<2x32xf32>
    %190 = arith.addf %188, %189 : vector<2x32xf32>
    %191 = math.tanh %190 : vector<2x32xf32>
    %192 = arith.mulf %187, %191 : vector<2x32xf32>
    %c3_69 = arith.constant 3 : index
    %c0_70 = arith.constant 0 : index
    %193 = tpu.strided_load %arg14[%c3_69, %c0_70] {strides = array<i32: 8, 1>} : memref<16x32xf32, #tpu.memory_space<vmem>>, vector<2x32xf32>
    tpu.strided_store %arg14[%c3_69, %c0_70], %192 {strides = array<i32: 8, 1>} : memref<16x32xf32, #tpu.memory_space<vmem>>, vector<2x32xf32>
    %cst_71 = arith.constant dense<0.000000e+00> : vector<2x128xf32>
    %194 = tpu.matmul %175, %14, %cst_71 {dimension_numbers = #tpu.dot_dimension_numbers<[1], [0], [0], [1], [0, 0, 1, 1], [], []>} : vector<2x32xf32>, vector<32x128xf32>, vector<2x128xf32> -> vector<2x128xf32>
    %195 = arith.addf %41, %194 : vector<2x128xf32>
    %196 = arith.mulf %195, %8 : vector<2x128xf32>
    %197 = math.tanh %196 : vector<2x128xf32>
    %198 = arith.mulf %197, %8 : vector<2x128xf32>
    %199 = arith.addf %198, %11 : vector<2x128xf32>
    %200 = vector.extract_strided_slice %199 {offsets = [0, 0], sizes = [2, 32], strides = [1, 1]} : vector<2x128xf32> to vector<2x32xf32>
    %201 = vector.extract_strided_slice %199 {offsets = [0, 32], sizes = [2, 32], strides = [1, 1]} : vector<2x128xf32> to vector<2x32xf32>
    %202 = vector.extract_strided_slice %199 {offsets = [0, 64], sizes = [2, 32], strides = [1, 1]} : vector<2x128xf32> to vector<2x32xf32>
    %203 = vector.extract_strided_slice %199 {offsets = [0, 96], sizes = [2, 32], strides = [1, 1]} : vector<2x128xf32> to vector<2x32xf32>
    %204 = arith.mulf %201, %173 : vector<2x32xf32>
    %205 = arith.mulf %200, %202 : vector<2x32xf32>
    %206 = arith.addf %204, %205 : vector<2x32xf32>
    %207 = math.tanh %206 : vector<2x32xf32>
    %208 = arith.mulf %203, %207 : vector<2x32xf32>
    %cst_72 = arith.constant dense<0.000000e+00> : vector<2x128xf32>
    %209 = tpu.matmul %208, %13, %cst_72 {dimension_numbers = #tpu.dot_dimension_numbers<[1], [0], [0], [1], [0, 0, 1, 1], [], []>} : vector<2x32xf32>, vector<32x128xf32>, vector<2x128xf32> -> vector<2x128xf32>
    %cst_73 = arith.constant dense<0.000000e+00> : vector<2x128xf32>
    %210 = tpu.matmul %192, %15, %cst_73 {dimension_numbers = #tpu.dot_dimension_numbers<[1], [0], [0], [1], [0, 0, 1, 1], [], []>} : vector<2x32xf32>, vector<32x128xf32>, vector<2x128xf32> -> vector<2x128xf32>
    %211 = arith.addf %209, %210 : vector<2x128xf32>
    %212 = arith.addf %211, %21 : vector<2x128xf32>
    %213 = arith.mulf %212, %8 : vector<2x128xf32>
    %214 = math.tanh %213 : vector<2x128xf32>
    %215 = arith.mulf %214, %8 : vector<2x128xf32>
    %216 = arith.addf %215, %11 : vector<2x128xf32>
    %217 = vector.extract_strided_slice %216 {offsets = [0, 0], sizes = [2, 32], strides = [1, 1]} : vector<2x128xf32> to vector<2x32xf32>
    %218 = vector.extract_strided_slice %216 {offsets = [0, 32], sizes = [2, 32], strides = [1, 1]} : vector<2x128xf32> to vector<2x32xf32>
    %219 = vector.extract_strided_slice %216 {offsets = [0, 64], sizes = [2, 32], strides = [1, 1]} : vector<2x128xf32> to vector<2x32xf32>
    %220 = vector.extract_strided_slice %216 {offsets = [0, 96], sizes = [2, 32], strides = [1, 1]} : vector<2x128xf32> to vector<2x32xf32>
    %221 = arith.mulf %218, %190 : vector<2x32xf32>
    %222 = arith.mulf %217, %219 : vector<2x32xf32>
    %223 = arith.addf %221, %222 : vector<2x32xf32>
    %224 = math.tanh %223 : vector<2x32xf32>
    %225 = arith.mulf %220, %224 : vector<2x32xf32>
    %c4_74 = arith.constant 4 : index
    %c0_75 = arith.constant 0 : index
    %226 = tpu.strided_load %arg14[%c4_74, %c0_75] {strides = array<i32: 8, 1>} : memref<16x32xf32, #tpu.memory_space<vmem>>, vector<2x32xf32>
    tpu.strided_store %arg14[%c4_74, %c0_75], %225 {strides = array<i32: 8, 1>} : memref<16x32xf32, #tpu.memory_space<vmem>>, vector<2x32xf32>
    %cst_76 = arith.constant dense<0.000000e+00> : vector<2x128xf32>
    %227 = tpu.matmul %208, %14, %cst_76 {dimension_numbers = #tpu.dot_dimension_numbers<[1], [0], [0], [1], [0, 0, 1, 1], [], []>} : vector<2x32xf32>, vector<32x128xf32>, vector<2x128xf32> -> vector<2x128xf32>
    %228 = arith.addf %45, %227 : vector<2x128xf32>
    %229 = arith.mulf %228, %8 : vector<2x128xf32>
    %230 = math.tanh %229 : vector<2x128xf32>
    %231 = arith.mulf %230, %8 : vector<2x128xf32>
    %232 = arith.addf %231, %11 : vector<2x128xf32>
    %233 = vector.extract_strided_slice %232 {offsets = [0, 0], sizes = [2, 32], strides = [1, 1]} : vector<2x128xf32> to vector<2x32xf32>
    %234 = vector.extract_strided_slice %232 {offsets = [0, 32], sizes = [2, 32], strides = [1, 1]} : vector<2x128xf32> to vector<2x32xf32>
    %235 = vector.extract_strided_slice %232 {offsets = [0, 64], sizes = [2, 32], strides = [1, 1]} : vector<2x128xf32> to vector<2x32xf32>
    %236 = vector.extract_strided_slice %232 {offsets = [0, 96], sizes = [2, 32], strides = [1, 1]} : vector<2x128xf32> to vector<2x32xf32>
    %237 = arith.mulf %234, %206 : vector<2x32xf32>
    %238 = arith.mulf %233, %235 : vector<2x32xf32>
    %239 = arith.addf %237, %238 : vector<2x32xf32>
    %240 = math.tanh %239 : vector<2x32xf32>
    %241 = arith.mulf %236, %240 : vector<2x32xf32>
    %cst_77 = arith.constant dense<0.000000e+00> : vector<2x128xf32>
    %242 = tpu.matmul %241, %13, %cst_77 {dimension_numbers = #tpu.dot_dimension_numbers<[1], [0], [0], [1], [0, 0, 1, 1], [], []>} : vector<2x32xf32>, vector<32x128xf32>, vector<2x128xf32> -> vector<2x128xf32>
    %cst_78 = arith.constant dense<0.000000e+00> : vector<2x128xf32>
    %243 = tpu.matmul %225, %15, %cst_78 {dimension_numbers = #tpu.dot_dimension_numbers<[1], [0], [0], [1], [0, 0, 1, 1], [], []>} : vector<2x32xf32>, vector<32x128xf32>, vector<2x128xf32> -> vector<2x128xf32>
    %244 = arith.addf %242, %243 : vector<2x128xf32>
    %245 = arith.addf %244, %21 : vector<2x128xf32>
    %246 = arith.mulf %245, %8 : vector<2x128xf32>
    %247 = math.tanh %246 : vector<2x128xf32>
    %248 = arith.mulf %247, %8 : vector<2x128xf32>
    %249 = arith.addf %248, %11 : vector<2x128xf32>
    %250 = vector.extract_strided_slice %249 {offsets = [0, 0], sizes = [2, 32], strides = [1, 1]} : vector<2x128xf32> to vector<2x32xf32>
    %251 = vector.extract_strided_slice %249 {offsets = [0, 32], sizes = [2, 32], strides = [1, 1]} : vector<2x128xf32> to vector<2x32xf32>
    %252 = vector.extract_strided_slice %249 {offsets = [0, 64], sizes = [2, 32], strides = [1, 1]} : vector<2x128xf32> to vector<2x32xf32>
    %253 = vector.extract_strided_slice %249 {offsets = [0, 96], sizes = [2, 32], strides = [1, 1]} : vector<2x128xf32> to vector<2x32xf32>
    %254 = arith.mulf %251, %223 : vector<2x32xf32>
    %255 = arith.mulf %250, %252 : vector<2x32xf32>
    %256 = arith.addf %254, %255 : vector<2x32xf32>
    %257 = math.tanh %256 : vector<2x32xf32>
    %258 = arith.mulf %253, %257 : vector<2x32xf32>
    %c5_79 = arith.constant 5 : index
    %c0_80 = arith.constant 0 : index
    %259 = tpu.strided_load %arg14[%c5_79, %c0_80] {strides = array<i32: 8, 1>} : memref<16x32xf32, #tpu.memory_space<vmem>>, vector<2x32xf32>
    tpu.strided_store %arg14[%c5_79, %c0_80], %258 {strides = array<i32: 8, 1>} : memref<16x32xf32, #tpu.memory_space<vmem>>, vector<2x32xf32>
    %cst_81 = arith.constant dense<0.000000e+00> : vector<2x128xf32>
    %260 = tpu.matmul %241, %14, %cst_81 {dimension_numbers = #tpu.dot_dimension_numbers<[1], [0], [0], [1], [0, 0, 1, 1], [], []>} : vector<2x32xf32>, vector<32x128xf32>, vector<2x128xf32> -> vector<2x128xf32>
    %261 = arith.addf %49, %260 : vector<2x128xf32>
    %262 = arith.mulf %261, %8 : vector<2x128xf32>
    %263 = math.tanh %262 : vector<2x128xf32>
    %264 = arith.mulf %263, %8 : vector<2x128xf32>
    %265 = arith.addf %264, %11 : vector<2x128xf32>
    %266 = vector.extract_strided_slice %265 {offsets = [0, 0], sizes = [2, 32], strides = [1, 1]} : vector<2x128xf32> to vector<2x32xf32>
    %267 = vector.extract_strided_slice %265 {offsets = [0, 32], sizes = [2, 32], strides = [1, 1]} : vector<2x128xf32> to vector<2x32xf32>
    %268 = vector.extract_strided_slice %265 {offsets = [0, 64], sizes = [2, 32], strides = [1, 1]} : vector<2x128xf32> to vector<2x32xf32>
    %269 = vector.extract_strided_slice %265 {offsets = [0, 96], sizes = [2, 32], strides = [1, 1]} : vector<2x128xf32> to vector<2x32xf32>
    %270 = arith.mulf %267, %239 : vector<2x32xf32>
    %271 = arith.mulf %266, %268 : vector<2x32xf32>
    %272 = arith.addf %270, %271 : vector<2x32xf32>
    %273 = math.tanh %272 : vector<2x32xf32>
    %274 = arith.mulf %269, %273 : vector<2x32xf32>
    %cst_82 = arith.constant dense<0.000000e+00> : vector<2x128xf32>
    %275 = tpu.matmul %274, %13, %cst_82 {dimension_numbers = #tpu.dot_dimension_numbers<[1], [0], [0], [1], [0, 0, 1, 1], [], []>} : vector<2x32xf32>, vector<32x128xf32>, vector<2x128xf32> -> vector<2x128xf32>
    %cst_83 = arith.constant dense<0.000000e+00> : vector<2x128xf32>
    %276 = tpu.matmul %258, %15, %cst_83 {dimension_numbers = #tpu.dot_dimension_numbers<[1], [0], [0], [1], [0, 0, 1, 1], [], []>} : vector<2x32xf32>, vector<32x128xf32>, vector<2x128xf32> -> vector<2x128xf32>
    %277 = arith.addf %275, %276 : vector<2x128xf32>
    %278 = arith.addf %277, %21 : vector<2x128xf32>
    %279 = arith.mulf %278, %8 : vector<2x128xf32>
    %280 = math.tanh %279 : vector<2x128xf32>
    %281 = arith.mulf %280, %8 : vector<2x128xf32>
    %282 = arith.addf %281, %11 : vector<2x128xf32>
    %283 = vector.extract_strided_slice %282 {offsets = [0, 0], sizes = [2, 32], strides = [1, 1]} : vector<2x128xf32> to vector<2x32xf32>
    %284 = vector.extract_strided_slice %282 {offsets = [0, 32], sizes = [2, 32], strides = [1, 1]} : vector<2x128xf32> to vector<2x32xf32>
    %285 = vector.extract_strided_slice %282 {offsets = [0, 64], sizes = [2, 32], strides = [1, 1]} : vector<2x128xf32> to vector<2x32xf32>
    %286 = vector.extract_strided_slice %282 {offsets = [0, 96], sizes = [2, 32], strides = [1, 1]} : vector<2x128xf32> to vector<2x32xf32>
    %287 = arith.mulf %284, %256 : vector<2x32xf32>
    %288 = arith.mulf %283, %285 : vector<2x32xf32>
    %289 = arith.addf %287, %288 : vector<2x32xf32>
    %290 = math.tanh %289 : vector<2x32xf32>
    %291 = arith.mulf %286, %290 : vector<2x32xf32>
    %c6_84 = arith.constant 6 : index
    %c0_85 = arith.constant 0 : index
    %292 = tpu.strided_load %arg14[%c6_84, %c0_85] {strides = array<i32: 8, 1>} : memref<16x32xf32, #tpu.memory_space<vmem>>, vector<2x32xf32>
    tpu.strided_store %arg14[%c6_84, %c0_85], %291 {strides = array<i32: 8, 1>} : memref<16x32xf32, #tpu.memory_space<vmem>>, vector<2x32xf32>
    %cst_86 = arith.constant dense<0.000000e+00> : vector<2x128xf32>
    %293 = tpu.matmul %274, %14, %cst_86 {dimension_numbers = #tpu.dot_dimension_numbers<[1], [0], [0], [1], [0, 0, 1, 1], [], []>} : vector<2x32xf32>, vector<32x128xf32>, vector<2x128xf32> -> vector<2x128xf32>
    %294 = arith.addf %53, %293 : vector<2x128xf32>
    %295 = arith.mulf %294, %8 : vector<2x128xf32>
    %296 = math.tanh %295 : vector<2x128xf32>
    %297 = arith.mulf %296, %8 : vector<2x128xf32>
    %298 = arith.addf %297, %11 : vector<2x128xf32>
    %299 = vector.extract_strided_slice %298 {offsets = [0, 0], sizes = [2, 32], strides = [1, 1]} : vector<2x128xf32> to vector<2x32xf32>
    %300 = vector.extract_strided_slice %298 {offsets = [0, 32], sizes = [2, 32], strides = [1, 1]} : vector<2x128xf32> to vector<2x32xf32>
    %301 = vector.extract_strided_slice %298 {offsets = [0, 64], sizes = [2, 32], strides = [1, 1]} : vector<2x128xf32> to vector<2x32xf32>
    %302 = vector.extract_strided_slice %298 {offsets = [0, 96], sizes = [2, 32], strides = [1, 1]} : vector<2x128xf32> to vector<2x32xf32>
    %303 = arith.mulf %300, %272 : vector<2x32xf32>
    %304 = arith.mulf %299, %301 : vector<2x32xf32>
    %305 = arith.addf %303, %304 : vector<2x32xf32>
    %306 = math.tanh %305 : vector<2x32xf32>
    %307 = arith.mulf %302, %306 : vector<2x32xf32>
    %cst_87 = arith.constant dense<0.000000e+00> : vector<2x128xf32>
    %308 = tpu.matmul %307, %13, %cst_87 {dimension_numbers = #tpu.dot_dimension_numbers<[1], [0], [0], [1], [0, 0, 1, 1], [], []>} : vector<2x32xf32>, vector<32x128xf32>, vector<2x128xf32> -> vector<2x128xf32>
    %cst_88 = arith.constant dense<0.000000e+00> : vector<2x128xf32>
    %309 = tpu.matmul %291, %15, %cst_88 {dimension_numbers = #tpu.dot_dimension_numbers<[1], [0], [0], [1], [0, 0, 1, 1], [], []>} : vector<2x32xf32>, vector<32x128xf32>, vector<2x128xf32> -> vector<2x128xf32>
    %310 = arith.addf %308, %309 : vector<2x128xf32>
    %311 = arith.addf %310, %21 : vector<2x128xf32>
    %312 = arith.mulf %311, %8 : vector<2x128xf32>
    %313 = math.tanh %312 : vector<2x128xf32>
    %314 = arith.mulf %313, %8 : vector<2x128xf32>
    %315 = arith.addf %314, %11 : vector<2x128xf32>
    %316 = vector.extract_strided_slice %315 {offsets = [0, 0], sizes = [2, 32], strides = [1, 1]} : vector<2x128xf32> to vector<2x32xf32>
    %317 = vector.extract_strided_slice %315 {offsets = [0, 32], sizes = [2, 32], strides = [1, 1]} : vector<2x128xf32> to vector<2x32xf32>
    %318 = vector.extract_strided_slice %315 {offsets = [0, 64], sizes = [2, 32], strides = [1, 1]} : vector<2x128xf32> to vector<2x32xf32>
    %319 = vector.extract_strided_slice %315 {offsets = [0, 96], sizes = [2, 32], strides = [1, 1]} : vector<2x128xf32> to vector<2x32xf32>
    %320 = arith.mulf %317, %289 : vector<2x32xf32>
    %321 = arith.mulf %316, %318 : vector<2x32xf32>
    %322 = arith.addf %320, %321 : vector<2x32xf32>
    %323 = math.tanh %322 : vector<2x32xf32>
    %324 = arith.mulf %319, %323 : vector<2x32xf32>
    %c7_89 = arith.constant 7 : index
    %c0_90 = arith.constant 0 : index
    %325 = tpu.strided_load %arg14[%c7_89, %c0_90] {strides = array<i32: 8, 1>} : memref<16x32xf32, #tpu.memory_space<vmem>>, vector<2x32xf32>
    tpu.strided_store %arg14[%c7_89, %c0_90], %324 {strides = array<i32: 8, 1>} : memref<16x32xf32, #tpu.memory_space<vmem>>, vector<2x32xf32>
    %c0_91 = arith.constant 0 : index
    %c0_92 = arith.constant 0 : index
    %c0_93 = arith.constant 0 : index
    %326 = vector.load %arg12[%c0_91, %c0_92, %c0_93] : memref<2x2x32xf32, #tpu.memory_space<vmem>>, vector<1x2x32xf32>
    %327 = vector.shape_cast %326 : vector<1x2x32xf32> to vector<2x32xf32>
    %328 = vector.shape_cast %307 : vector<2x32xf32> to vector<1x2x32xf32>
    tpu.vector_store %arg12[%c0_91, %c0_92, %c0_93], %328 {strides = array<i32>} : memref<2x2x32xf32, #tpu.memory_space<vmem>>, vector<1x2x32xf32>,
    %c0_94 = arith.constant 0 : index
    %c0_95 = arith.constant 0 : index
    %c0_96 = arith.constant 0 : index
    %329 = vector.load %arg13[%c0_94, %c0_95, %c0_96] : memref<2x2x32xf32, #tpu.memory_space<vmem>>, vector<1x2x32xf32>
    %330 = vector.shape_cast %329 : vector<1x2x32xf32> to vector<2x32xf32>
    %331 = vector.shape_cast %305 : vector<2x32xf32> to vector<1x2x32xf32>
    tpu.vector_store %arg13[%c0_94, %c0_95, %c0_96], %331 {strides = array<i32>} : memref<2x2x32xf32, #tpu.memory_space<vmem>>, vector<1x2x32xf32>,
    %c1_97 = arith.constant 1 : index
    %c0_98 = arith.constant 0 : index
    %c0_99 = arith.constant 0 : index
    %332 = vector.load %arg12[%c1_97, %c0_98, %c0_99] : memref<2x2x32xf32, #tpu.memory_space<vmem>>, vector<1x2x32xf32>
    %333 = vector.shape_cast %332 : vector<1x2x32xf32> to vector<2x32xf32>
    %334 = vector.shape_cast %324 : vector<2x32xf32> to vector<1x2x32xf32>
    tpu.vector_store %arg12[%c1_97, %c0_98, %c0_99], %334 {strides = array<i32>} : memref<2x2x32xf32, #tpu.memory_space<vmem>>, vector<1x2x32xf32>,
    %c1_100 = arith.constant 1 : index
    %c0_101 = arith.constant 0 : index
    %c0_102 = arith.constant 0 : index
    %335 = vector.load %arg13[%c1_100, %c0_101, %c0_102] : memref<2x2x32xf32, #tpu.memory_space<vmem>>, vector<1x2x32xf32>
    %336 = vector.shape_cast %335 : vector<1x2x32xf32> to vector<2x32xf32>
    %337 = vector.shape_cast %322 : vector<2x32xf32> to vector<1x2x32xf32>
    tpu.vector_store %arg13[%c1_100, %c0_101, %c0_102], %337 {strides = array<i32>} : memref<2x2x32xf32, #tpu.memory_space<vmem>>, vector<1x2x32xf32>,
    %c0_103 = arith.constant 0 : index
    %c0_104 = arith.constant 0 : index
    %338 = vector.load %arg9[%c0_103, %c0_104] : memref<32x25xf32, #tpu.memory_space<vmem>>, vector<32x25xf32>
    %c0_105 = arith.constant 0 : index
    %c0_106 = arith.constant 0 : index
    %339 = vector.load %arg10[%c0_105, %c0_106] : memref<1x25xf32, #tpu.memory_space<vmem>>, vector<1x25xf32>
    %c0_107 = arith.constant 0 : index
    %c0_108 = arith.constant 0 : index
    %340 = vector.load %arg14[%c0_107, %c0_108] : memref<16x32xf32, #tpu.memory_space<vmem>>, vector<16x32xf32>
    %cst_109 = arith.constant dense<0.000000e+00> : vector<16x25xf32>
    %341 = tpu.matmul %340, %338, %cst_109 {dimension_numbers = #tpu.dot_dimension_numbers<[1], [0], [0], [1], [0, 0, 1, 1], [], []>} : vector<16x32xf32>, vector<32x25xf32>, vector<16x25xf32> -> vector<16x25xf32>
    %342 = vector.broadcast %339 : vector<1x25xf32> to vector<16x25xf32>
    %343 = arith.addf %341, %342 : vector<16x25xf32>
    %344 = tpu.iota {dimensions = array<i32: 1>} : vector<16x25xi32>
    %c16_i32 = arith.constant 16 : i32
    %345 = vector.broadcast %c16_i32 : i32 to vector<16x25xi32>
    %346 = arith.cmpi sge, %344, %345 : vector<16x25xi32>
    %c20_i32 = arith.constant 20 : i32
    %347 = vector.broadcast %c20_i32 : i32 to vector<16x25xi32>
    %348 = arith.cmpi slt, %344, %347 : vector<16x25xi32>
    %349 = arith.andi %346, %348 : vector<16x25xi1>
    %350 = math.tanh %343 : vector<16x25xf32>
    %351 = arith.select %349, %350, %343 : vector<16x25xi1>, vector<16x25xf32>
    %c0_110 = arith.constant 0 : index
    %c0_111 = arith.constant 0 : index
    %352 = vector.load %arg11[%c0_110, %c0_111] : memref<16x25xf32, #tpu.memory_space<vmem>>, vector<16x25xf32>
    tpu.vector_store %arg11[%c0_110, %c0_111], %351 {strides = array<i32>} : memref<16x25xf32, #tpu.memory_space<vmem>>, vector<16x25xf32>,
    return
  }
}

</mosaic_0001>

<bundles_post_ra>
// kernel: uncon_gen_forward.1
= control target key start
LH: loop header
LB: loop body
LE: loop exit
PB: predicated region body
PF: predicated region fallthrough
CT: control target
= control target key end

     0   :  { %19 = vsyncpa [#allocation4], 0  ;;  %s2249_s0 = inlined_call_operand.vmem [shape: f32[2,8,3], index: 0, kind: input, shape index: {}]   ;;  %s2250_s1 = inlined_call_operand.vmem [shape: f32[2,2,32], index: 1, kind: input, shape index: {}]   ;;  %s2251_s2 = inlined_call_operand.vmem [shape: f32[2,2,32], index: 2, kind: input, shape index: {}]   ;;  %s2252_s3 = inlined_call_operand.vmem [shape: f32[3,128], index: 3, kind: input, shape index: {}]   ;;  %s2253_s4 = inlined_call_operand.hbm [shape: f32[32,128], index: 4, kind: input, shape index: {}]   ;;  %s2254_s5 = inlined_call_operand.vmem [shape: f32[1,128], index: 5, kind: input, shape index: {}]   ;;  %s2255_s6 = inlined_call_operand.hbm [shape: f32[32,128], index: 6, kind: input, shape index: {}]   ;;  %s2256_s7 = inlined_call_operand.hbm [shape: f32[32,128], index: 7, kind: input, shape index: {}]   ;;  %s2257_s8 = inlined_call_operand.vmem [shape: f32[1,128], index: 8, kind: input, shape index: {}]   ;;  %s2258_s9 = inlined_call_operand.hbm [shape: f32[32,25], index: 9, kind: input, shape index: {}]   ;;  %s2259_s10 = inlined_call_operand.vmem [shape: f32[1,25], index: 10, kind: input, shape index: {}]   ;;  %s2260_s11 = inlined_call_operand.vmem [shape: f32[16,25], index: 11, kind: output, shape index: {0}]   ;;  %s2261_s12 = inlined_call_operand.hbm [shape: f32[2,2,32], index: 12, kind: output, shape index: {1}]   ;;  %s2262_s13 = inlined_call_operand.hbm [shape: f32[2,2,32], index: 13, kind: output, shape index: {2}]  }
   0x1   :  { %20 = vsyncpa [#allocation7], 0 }
   0x2   :  { %21 = vsyncpa [#allocation10], 0 }
   0x3   :  { %22 = vsyncpa [#allocation5], 0 }
   0x4   :  { %23 = vsyncpa [#allocation13], 0  ;;  %s51_s27 = sshll.u32 %s2255_s6, 4  ;;  %s1716_s28 = smov [#allocation6]   ;;  %s52_s27 = int_to_ptr.hbm [resolvable:$true] %s51_s27 }
   0x5   :  { %s53_s29 = sshll.u32 %s1716_s28, 4  ;;  %s36_s15 = sshll.u32 %s2253_s4, 4  ;;  %s54_s29 = int_to_ptr.vmem [resolvable:$true] %s53_s29  ;;  %s37_s15 = int_to_ptr.hbm [resolvable:$true] %s36_s15 }
   0x6   :  { %s1717_s16 = smov 128   ;;  %s1718_s17 = smov 8  }
   0x7   :  { %59 = dma.hbm_to_vmem [thread:$0]  %s52_s27, 512, %s54_s29, [#allocation7], %s1717_s16, %s1717_s16, %s1718_s17  }
   0x8   :  { %s1719_s18 = smov [#allocation3]   ;;  %s64_s22 = sshll.u32 %s2256_s7, 4  ;;  %s65_s22 = int_to_ptr.hbm [resolvable:$true] %s64_s22 }
   0x9   :  { %s38_s19 = sshll.u32 %s1719_s18, 4  ;;  %s79_s24 = sshll.u32 %s2258_s9, 4  ;;  %s39_s19 = int_to_ptr.vmem [resolvable:$true] %s38_s19  ;;  %s80_s24 = int_to_ptr.hbm [resolvable:$true] %s79_s24 }
   0xa   :  { %44 = dma.hbm_to_vmem [thread:$0]  %s37_s15, 512, %s39_s19, [#allocation4], %s1717_s16, %s1717_s16, %s1718_s17  }
   0xb   :  { %s1720_s25 = smov [#allocation8]   ;;  %s1721_s4 = smov [#allocation9]  }
   0xc   :  { %s66_s26 = sshll.u32 %s1720_s25, 4  ;;  %s81_s27 = sshll.u32 %s1721_s4, 4  ;;  %s67_s26 = int_to_ptr.vmem [resolvable:$true] %s66_s26  ;;  %s82_s27 = int_to_ptr.vmem [resolvable:$true] %s81_s27 }
   0xd   :  { %72 = dma.hbm_to_vmem [thread:$0]  %s65_s22, 512, %s67_s26, [#allocation7], %s1717_s16, %s1717_s16, %s1718_s17  }
   0xe   :  { %87 = dma.hbm_to_vmem [thread:$0]  %s80_s24, 512, %s82_s27, [#allocation10], %s1717_s16, %s1717_s16, %s1718_s17  }
   0xf   :  { %1706 = dma.done.wait [#allocation4], 512  }
  0x10   :  { %1707 = vsyncadd [#allocation4], 4294966784 }
  0x11   :  { %1708 = dma.done.wait [#allocation7], 1024  }
  0x12   :  { %1709 = vsyncadd [#allocation7], 4294966272 }
  0x13   :  { %1710 = dma.done.wait [#allocation10], 512  }
  0x14   :  { %1711 = vsyncadd [#allocation10], 4294966784  ;;  %vm144_vm0 = vcmask 1042432   ;;  %vm139_vm1 = vcmask 1041409   ;;  %v113_v0 = vld [vmem:[%s2252_s3] sm:$0x7]  ;;  %v106_v14 = vlaneseq }
  0x15   :  { %v252_v1 = vld [vmem:[%s2249_s0 + $0x4] sm:$0x1]  ;;  %v253_v2 = vld [vmem:[%s2249_s0 + $0xc] sm:$0x1]  ;;  %1442 = vmatpush.msk.msra.mxu0 %vm144_vm0, %v113_v0  ;;  %vm141_vm2 = vcmask 23552   ;;  %1434 = vmatpush.msk.msra.mxu1 %vm144_vm0, %v113_v0  ;;  %v1838_v10 = vld [vmem:[#allocation3 + $0x8] sm:$0xff] }
  0x16   :  { %v256_v3 = vrot.slane %v253_v2, 7  ;;  %v1821_v4 = vld [vmem:[#allocation3 + $0x18] sm:$0xff]  ;;  %v1825_v5 = vld [vmem:[#allocation3 + $0x10] sm:$0xff]  ;;  %1438 = vmatpush.msk.msra.mxu2 %vm144_vm0, %v113_v0  ;;  %1440 = vmatpush.msk.msra.mxu3 %vm144_vm0, %v113_v0  ;;  %v1845_v12 = vld [vmem:[#allocation3] sm:$0xff]  ;;  %vm370_vm3 = vcmask 261120   ;;  %v1854_v15 = vand.u32 127, %v106_v14 }
  0x17   :  { %386 = vmatpush.msrb.mxu0 %v1821_v4  ;;  %v134_v6 = vld [vmem:[%s2249_s0] sm:$0x1]  ;;  %v135_v7 = vld [vmem:[%s2249_s0 + $0x8] sm:$0x1]  ;;  %1436 = vmatpush.msk.msrb.mxu1 %vm144_vm0, %v113_v0  ;;  %v1722_v20 = vmov 0.5   ;;  %s1724_s23 = smov 32  }
  0x18   :  { %v257_v8 = vsel %vm139_vm1, %v256_v3, %v252_v1  ;;  %v138_v9 = vrot.slane %v135_v7, 7  ;;  %1448 = vmatpush.msk.msrb.mxu3 %vm144_vm0, %v113_v0  ;;  %1446 = vmatpush.msk.msrb.mxu2 %vm144_vm0, %v113_v0  ;;  %v364_v13 = vld [vmem:[%s2250_s1] sm:$0x3]  ;;  %vm108_vm4 = vcmp.ge.s32.totalorder %v1854_v15, 64  ;;  %vm109_vm5 = vcmp.lt.s32.totalorder %v1854_v15, 96  ;;  %v1906_v45 = vld [vmem:[#allocation6 + $0x18] sm:$0xff] }
  0x19   :  { %1443 = vmatmul.msk.f32.vlgmr.msra.gmra.mxu0 %vm141_vm2, %v257_v8  ;;  %v1863_v18 = vld [vmem:[%s2254_s5] ss:$0 sm:$0xff]  ;;  %vm110_vm6 = vmand %vm108_vm4, %vm109_vm5  ;;  %s1723_s5 = smov 64   ;;  %v196_v37 = vld [vmem:[%s2249_s0 + $0x2] sm:$0x1]  ;;  %vm1327_vm7 = vcmask 254976  }
  0x1a   :  { %387 = vmatpush.msrb.mxu0 %v1825_v5  ;;  %v140_v11 = vsel %vm139_vm1, %v138_v9, %v134_v6  ;;  %v1866_v21 = vsel %vm110_vm6, 1.0, %v1722_v20  ;;  %v1869_v26 = vsel %vm110_vm6, 0.0, %v1722_v20  ;;  %v367_v29 = vld [vmem:[%s2251_s2] sm:$0x3]  ;;  %v197_v38 = vld [vmem:[%s2249_s0 + $0xa] sm:$0x1] }
  0x1b   :  { %1435 = vmatmul.msk.f32.vlgmr.msra.gmra.mxu1 %vm141_vm2, %v140_v11  ;;  %v200_v39 = vrot.slane %v197_v38, 7  ;;  %v224_v40 = vld [vmem:[%s2249_s0 + $0x3] sm:$0x1]  ;;  %v225_v41 = vld [vmem:[%s2249_s0 + $0xb] sm:$0x1]  ;;  %v1932_v58 = vld [vmem:[#allocation6 + $0x8] sm:$0xff] }
  0x1c   :  { %388 = vmatpush.msrb.mxu0 %v1838_v10  ;;  %1444 = vmatpush.msk.msra.mxu1 %vm144_vm0, %v113_v0  ;;  %v228_v42 = vrot.slane %v225_v41, 7  ;;  %v168_v43 = vld [vmem:[%s2249_s0 + $0x1] sm:$0x1]  ;;  %v169_v44 = vld [vmem:[%s2249_s0 + $0x9] sm:$0x1]  ;;  %v1943_v62 = vld [vmem:[#allocation6] sm:$0xff] }
  0x1d   :  { %v201_v46 = vsel %vm139_vm1, %v200_v39, %v196_v37  ;;  %v172_v47 = vrot.slane %v169_v44, 7  ;;  %v309_v48 = vld [vmem:[%s2249_s0 + $0xe] sm:$0x1]  ;;  %v337_v50 = vld [vmem:[%s2249_s0 + $0xf] sm:$0x1]  ;;  %v1917_v51 = vld [vmem:[#allocation6 + $0x10] sm:$0xff] }
  0x1e   :  { %389 = vmatpush.msrb.mxu0 %v1845_v12  ;;  %1439 = vmatmul.msk.f32.vlgmr.msra.gmra.mxu2 %vm141_vm2, %v201_v46  ;;  %v229_v49 = vsel %vm139_vm1, %v228_v42, %v224_v40  ;;  %v1919_v52 = vld [vmem:[#allocation8 + $0x18] sm:$0xff]  ;;  %v312_v54 = vrot.slane %v309_v48, 7  ;;  %v308_v56 = vld [vmem:[%s2249_s0 + $0x6] sm:$0x1]  ;;  %v340_v57 = vrot.slane %v337_v50, 7  ;;  %v1965_v7 = vld [vmem:[#allocation8 + $0x8] sm:$0xff] }
  0x1f   :  { %1441 = vmatmul.msk.f32.vlgmr.msra.gmra.mxu3 %vm141_vm2, %v229_v49  ;;  %v173_v53 = vsel %vm139_vm1, %v172_v47, %v168_v43  ;;  %460 = vmatpush.msra.mxu2 %v1906_v45  ;;  %v281_v55 = vld [vmem:[%s2249_s0 + $0xd] sm:$0x1]  ;;  %v336_v59 = vld [vmem:[%s2249_s0 + $0x7] sm:$0x1]  ;;  %v280_v61 = vld [vmem:[%s2249_s0 + $0x5] sm:$0x1] }
  0x20   :  { %512 = vmatpush.msra.mxu3 %v1821_v4  ;;  %v284_v60 = vrot.slane %v281_v55, 7  ;;  %556 = vmatpush.msra.mxu0 %v1919_v52  ;;  %v313_v63 = vsel %vm139_vm1, %v312_v54, %v308_v56  ;;  %v341_v0 = vsel %vm139_vm1, %v340_v57, %v336_v59  ;;  %v1963_v6 = vld [vmem:[#allocation8 + $0x10] sm:$0xff]  ;;  %v1972_v9 = vld [vmem:[#allocation8] sm:$0xff]  ;;  %s1399_s30 = sshll.u32 %s2261_s12, 4  ;;  %s1727_s14 = smov [#allocation12]   ;;  %vm1381_vm8 = vcmp.ge.s32.totalorder %v1854_v15, 16  ;;  %s1400_s30 = int_to_ptr.hbm [resolvable:$true] %s1399_s30 }
  0x21   :  { %1452 = vmatmul.msk.f32.vlgmr.msrb.gmra.mxu0 %vm370_vm3, %v364_v13  ;;  %461 = vmatpush.msra.mxu2 %v1917_v51  ;;  %v1451_v8 = vld [vmem:[%s2251_s2 + $0x2] sm:$0x3]  ;;  %s1410_s3 = sshll.u32 %s1727_s14, 4  ;;  %s1728_s15 = smov 2   ;;  %vm1382_vm9 = vcmp.lt.s32.totalorder %v1854_v15, 20  ;;  %vm1388_vm11 = vcmask 203776   ;;  %s1411_s3 = int_to_ptr.vmem [resolvable:$true] %s1410_s3 }
  0x22   :  { %513 = vmatpush.msra.mxu3 %v1825_v5  ;;  %v285_v1 = vsel %vm139_vm1, %v284_v60, %v280_v61  ;;  %557 = vmatpush.msra.mxu0 %v1963_v6  ;;  %v1450_v11 = vld [vmem:[%s2250_s1 + $0x2] sm:$0x3]  ;;  %s1412_s18 = sshll.u32 %s2262_s13, 4  ;;  %vm1383_vm10 = vmand %vm1381_vm8, %vm1382_vm9  ;;  %s1413_s18 = int_to_ptr.hbm [resolvable:$true] %s1412_s18 }
  0x23   :  { %1437 = vmatmul.msk.f32.vlgmr.msrb.gmra.mxu1 %vm141_vm2, %v173_v53  ;;  %462 = vmatpush.msra.mxu2 %v1932_v58 }
  0x24   :  { %435 = vmatpush.msrb.mxu1 %v1919_v52  ;;  %514 = vmatpush.msra.mxu3 %v1838_v10 }
  0x25   :  { %463 = vmatpush.msra.mxu2 %v1943_v62  ;;  %558 = vmatpush.msra.mxu0 %v1965_v7 }
  0x26   :  { %1447 = vmatmul.msk.f32.vlgmr.msrb.gmra.mxu2 %vm141_vm2, %v313_v63  ;;  %515 = vmatpush.msra.mxu3 %v1845_v12 }
  0x27   :  { %1449 = vmatmul.msk.f32.vlgmr.msrb.gmra.mxu3 %vm141_vm2, %v341_v0  ;;  %630 = vmatpush.msrb.mxu2 %v1821_v4 }
  0x28   :  { %674 = vmatpush.msrb.mxu3 %v1919_v52  ;;  %436 = vmatpush.msrb.mxu1 %v1963_v6 }
  0x29   :  { %631 = vmatpush.msrb.mxu2 %v1825_v5  ;;  %559 = vmatpush.msra.mxu0 %v1972_v9 }
  0x2a   :  { %675 = vmatpush.msrb.mxu3 %v1963_v6  ;;  %437 = vmatpush.msrb.mxu1 %v1965_v7 }
  0x2b   :  { %1445 = vmatmul.msk.f32.vlgmr.msra.gmra.mxu1 %vm141_vm2, %v285_v1  ;;  %632 = vmatpush.msrb.mxu2 %v1838_v10 }
  0x2c   :  { %676 = vmatpush.msrb.mxu3 %v1965_v7  ;;  %438 = vmatpush.msrb.mxu1 %v1972_v9 }
  0x2d   :  { %633 = vmatpush.msrb.mxu2 %v1845_v12  ;;  %699 = vmatpush.msrb.mxu0 %v1906_v45 }
  0x2e   :  { %677 = vmatpush.msrb.mxu3 %v1972_v9  ;;  %581 = vmatpush.msra.mxu1 %v1906_v45 }
  0x2f   :  { %700 = vmatpush.msrb.mxu0 %v1917_v51 }
  0x30   :  { %582 = vmatpush.msra.mxu1 %v1917_v51 }
  0x31   :  { %701 = vmatpush.msrb.mxu0 %v1932_v58 }
  0x32   :  { %583 = vmatpush.msra.mxu1 %v1932_v58 }
  0x33   :  { %1453 = vmatmul.msk.f32.vlgmr.msrb.gmra.mxu1 %vm370_vm3, %v1450_v11  ;;  %702 = vmatpush.msrb.mxu0 %v1943_v62 }
  0x34   :  { %584 = vmatpush.msra.mxu1 %v1943_v62 }
  0x36   :  { %748 = vmatpush.msrb.mxu1 %v1821_v4 }
  0x38   :  { %749 = vmatpush.msrb.mxu1 %v1825_v5 }
  0x3a   :  { %750 = vmatpush.msrb.mxu1 %v1838_v10 }
  0x3c   :  { %751 = vmatpush.msrb.mxu1 %v1845_v12 }
  0x96   :  { %v1856_v16 = vpop.f32.mrf.mxu0 }
  0x98   :  { %v165_v17 = vpop.f32.mrf.mxu1 }
  0x99   :  { %v166_v19 = vadd.f32 %v1863_v18, %v165_v17 }
  0x9e   :  { %v391_v22 = vpop.f32.mrf.mxu0 }
  0x9f   :  { %v394_v23 = vadd.f32 %v391_v22, %v166_v19 }
  0xa0   :  { %v193_v14 = vpop.f32.mrf.mxu1 }
  0xa1   :  { %v395_v24 = vmul.f32 %v394_v23, %v1866_v21  ;;  %v2008_v17 = vpop.f32.mrf.mxu2 }
  0xa2   :  { %v2010_v19 = vpop.f32.mrf.mxu3  ;;  %v222_v11 = vadd.f32 %v1863_v18, %v2008_v17 }
  0xa3   :  { %1494 = vtanh.f32 %v395_v24  ;;  %v194_v24 = vadd.f32 %v1863_v18, %v193_v14 }
  0xa8   :  { %v2012_v20 = vpop.f32.mrf.mxu1 }
  0xa9   :  { %v1495_v25 = vpop.eup %1494  ;;  %v2014_v22 = vpop.f32.mrf.mxu2 }
  0xaa   :  { %v397_v27 = vmul.f32 %v1495_v25, %v1866_v21  ;;  %v2016_v23 = vpop.f32.mrf.mxu3 }
  0xac   :  { %v1873_v28 = vadd.f32 %v397_v27, %v1869_v26  ;;  %v2022_v27 = vld [vmem:[%s2257_s8] ss:$0 sm:$0xff]  ;;  %s1725_s8 = smov 96  }
  0xae   :  { %405 = vrot.lane.b32.xlu0 %v1873_v28, %s1723_s5 }
  0xb0   :  { %v440_v25 = vpop.f32.mrf.mxu1 }
  0xb6   :  { %400 = vrot.lane.b32.xlu0 %v367_v29, %s1724_s23 }
 0x120   :  { %v406_v30 = vpop.permute.xlu0 %405 }
 0x121   :  { %v408_v31 = vmul.f32 %v406_v30, %v1873_v28 }
 0x123   :  { %410 = vrot.lane.b32.xlu1 %v408_v31, %s1724_s23 }
 0x128   :  { %v401_v32 = vpop.permute.xlu0 %400 }
 0x129   :  { %v403_v33 = vmul.f32 %v401_v32, %v1873_v28 }
 0x195   :  { %v411_v34 = vpop.permute.xlu1 %410 }
 0x196   :  { %v1884_v35 = vadd.f32 %v411_v34, %v403_v33 }
 0x198   :  { %1496 = vtanh.f32 %v1884_v35 }
 0x19e   :  { %v1497_v36 = vpop.eup %1496 }
 0x19f   :  { %416 = vrot.lane.b32.xlu1 %v1497_v36, %s1723_s5 }
 0x1a7   :  { %474 = vrot.lane.b32.xlu1 %v1451_v8, %s1724_s23 }
 0x211   :  { %v417_v2 = vpop.permute.xlu1 %416 }
 0x212   :  { %v419_v3 = vmul.f32 %v417_v2, %v1873_v28 }
 0x214   :  { %444 = vrot.lane.b32.xlu2 %v419_v3, %s1724_s23 }
 0x219   :  { %v475_v47 = vpop.permute.xlu1 %474 }
 0x26e   :  { %v445_v13 = vpop.permute.xlu2 %444 }
 0x26f   :  { %1454 = vmatmul.msk.f32.vlgmr.msra.gmra.mxu2 %vm370_vm3, %v445_v13  ;;  %1455 = vmatmul.msk.f32.vlgmr.msra.gmra.mxu3 %vm370_vm3, %v445_v13 }
 0x270   :  { %817 = vmatpush.msra.mxu3 %v1906_v45  ;;  %792 = vmatpush.msra.mxu2 %v1919_v52 }
 0x272   :  { %818 = vmatpush.msra.mxu3 %v1917_v51  ;;  %793 = vmatpush.msra.mxu2 %v1963_v6 }
 0x274   :  { %819 = vmatpush.msra.mxu3 %v1932_v58  ;;  %794 = vmatpush.msra.mxu2 %v1965_v7 }
 0x276   :  { %820 = vmatpush.msra.mxu3 %v1943_v62  ;;  %795 = vmatpush.msra.mxu2 %v1972_v9 }
 0x2f2   :  { %v465_v28 = vpop.f32.mrf.mxu2  ;;  %v517_v29 = vpop.f32.mrf.mxu3 }
 0x2f3   :  { %v466_v30 = vadd.f32 %v465_v28, %v440_v25  ;;  %v520_v31 = vadd.f32 %v517_v29, %v194_v24 }
 0x2f5   :  { %v468_v32 = vadd.f32 %v2022_v27, %v466_v30  ;;  %v521_v33 = vmul.f32 %v520_v31, %v1866_v21 }
 0x2f7   :  { %v469_v34 = vmul.f32 %v468_v32, %v1866_v21  ;;  %1498 = vtanh.f32 %v521_v33 }
 0x2f9   :  { %1500 = vtanh.f32 %v469_v34 }
 0x2fd   :  { %v1499_v36 = vpop.eup %1498 }
 0x2fe   :  { %v523_v37 = vmul.f32 %v1499_v36, %v1866_v21 }
 0x2ff   :  { %v1501_v38 = vpop.eup %1500 }
 0x300   :  { %v524_v39 = vadd.f32 %v523_v37, %v1869_v26  ;;  %v471_v40 = vmul.f32 %v1501_v38, %v1866_v21 }
 0x302   :  { %527 = vrot.lane.b32.xlu0 %v524_v39, %s1723_s5  ;;  %v472_v41 = vadd.f32 %v471_v40, %v1869_v26  ;;  %v525_v54 = vmul.f32 %v524_v39, %v1884_v35 }
 0x304   :  { %479 = vrot.lane.b32.xlu2 %v472_v41, %s1723_s5  ;;  %v477_v48 = vmul.f32 %v475_v47, %v472_v41 }
 0x35e   :  { %v480_v42 = vpop.permute.xlu2 %479 }
 0x35f   :  { %v482_v43 = vmul.f32 %v480_v42, %v472_v41 }
 0x361   :  { %484 = vrot.lane.b32.xlu2 %v482_v43, %s1724_s23 }
 0x374   :  { %v528_v44 = vpop.permute.xlu0 %527 }
 0x375   :  { %v530_v46 = vmul.f32 %v528_v44, %v524_v39 }
 0x377   :  { %532 = vrot.lane.b32.xlu0 %v530_v46, %s1724_s23 }
 0x3bb   :  { %v485_v49 = vpop.permute.xlu2 %484 }
 0x3bc   :  { %v487_v50 = vadd.f32 %v485_v49, %v477_v48 }
 0x3be   :  { %1502 = vtanh.f32 %v487_v50 }
 0x3c4   :  { %v1503_v53 = vpop.eup %1502 }
 0x3c5   :  { %490 = vrot.lane.b32.xlu1 %v1503_v53, %s1723_s5 }
 0x3e9   :  { %v533_v55 = vpop.permute.xlu0 %532 }
 0x3ea   :  { %v535_v56 = vadd.f32 %v533_v55, %v525_v54  ;;  %v250_v55 = vadd.f32 %v1863_v18, %v2010_v19 }
 0x3ec   :  { %1504 = vtanh.f32 %v535_v56 }
 0x3f2   :  { %v1505_v57 = vpop.eup %1504 }
 0x3f3   :  { %538 = vrot.lane.b32.xlu2 %v1505_v57, %s1723_s5 }
 0x437   :  { %v491_v59 = vpop.permute.xlu1 %490 }
 0x438   :  { %v493_v60 = vmul.f32 %v491_v59, %v472_v41 }
 0x43a   :  { %495 = vrot.lane.b32.xlu0 %v493_v60, %s1724_s23 }
 0x44d   :  { %v539_v61 = vpop.permute.xlu2 %538 }
 0x44e   :  { %v541_v63 = vmul.f32 %v539_v61, %v524_v39 }
 0x450   :  { %565 = vrot.lane.b32.xlu1 %v541_v63, %s1724_s23 }
 0x4ac   :  { %v496_v0 = vpop.permute.xlu0 %495 }
 0x4ad   :  { %498 = vst [vmem:[#allocation2] ss:$8 sm:$0x3] %v496_v0  ;;  %1456 = vmatmul.msk.f32.vlgmr.msra.gmra.mxu0 %vm370_vm3, %v496_v0 }
 0x4ae   :  { %866 = vmatpush.msra.mxu0 %v1821_v4 }
 0x4b0   :  { %867 = vmatpush.msra.mxu0 %v1825_v5 }
 0x4b2   :  { %868 = vmatpush.msra.mxu0 %v1838_v10 }
 0x4b4   :  { %869 = vmatpush.msra.mxu0 %v1845_v12 }
 0x4c2   :  { %v566_v35 = vpop.permute.xlu1 %565 }
 0x4c3   :  { %1457 = vmatmul.msk.f32.vlgmr.msra.gmra.mxu1 %vm370_vm3, %v566_v35  ;;  %1458 = vmatmul.msk.f32.vlgmr.msrb.gmra.mxu2 %vm370_vm3, %v566_v35 }
 0x4c4   :  { %935 = vmatpush.msrb.mxu2 %v1906_v45  ;;  %910 = vmatpush.msra.mxu1 %v1919_v52 }
 0x4c6   :  { %936 = vmatpush.msrb.mxu2 %v1917_v51  ;;  %911 = vmatpush.msra.mxu1 %v1963_v6 }
 0x4c8   :  { %937 = vmatpush.msrb.mxu2 %v1932_v58  ;;  %912 = vmatpush.msra.mxu1 %v1965_v7 }
 0x4ca   :  { %938 = vmatpush.msrb.mxu2 %v1943_v62  ;;  %913 = vmatpush.msra.mxu1 %v1972_v9 }
 0x52a   :  { %v561_v1 = vpop.f32.mrf.mxu0 }
 0x540   :  { %v586_v2 = vpop.f32.mrf.mxu1 }
 0x541   :  { %v587_v3 = vadd.f32 %v586_v2, %v561_v1 }
 0x543   :  { %v589_v8 = vadd.f32 %v2022_v27, %v587_v3 }
 0x545   :  { %v590_v13 = vmul.f32 %v589_v8, %v1866_v21 }
 0x546   :  { %v635_v14 = vpop.f32.mrf.mxu2 }
 0x547   :  { %1506 = vtanh.f32 %v590_v13  ;;  %v638_v24 = vadd.f32 %v635_v14, %v222_v11 }
 0x549   :  { %v639_v25 = vmul.f32 %v638_v24, %v1866_v21 }
 0x54b   :  { %1508 = vtanh.f32 %v639_v25 }
 0x54d   :  { %v1507_v28 = vpop.eup %1506 }
 0x54e   :  { %v592_v29 = vmul.f32 %v1507_v28, %v1866_v21 }
 0x550   :  { %v593_v30 = vadd.f32 %v592_v29, %v1869_v26 }
 0x551   :  { %v1509_v31 = vpop.eup %1508 }
 0x552   :  { %596 = vrot.lane.b32.xlu2 %v593_v30, %s1723_s5  ;;  %v641_v32 = vmul.f32 %v1509_v31, %v1866_v21  ;;  %v594_v38 = vmul.f32 %v593_v30, %v487_v50 }
 0x554   :  { %v642_v17 = vadd.f32 %v641_v32, %v1869_v26 }
 0x556   :  { %645 = vrot.lane.b32.xlu0 %v642_v17, %s1723_s5  ;;  %v643_v41 = vmul.f32 %v642_v17, %v535_v56 }
 0x5ac   :  { %v597_v33 = vpop.permute.xlu2 %596 }
 0x5ad   :  { %v599_v34 = vmul.f32 %v597_v33, %v593_v30 }
 0x5af   :  { %601 = vrot.lane.b32.xlu1 %v599_v34, %s1724_s23 }
 0x5c8   :  { %v646_v36 = vpop.permute.xlu0 %645 }
 0x5c9   :  { %v648_v37 = vmul.f32 %v646_v36, %v642_v17 }
 0x5cb   :  { %650 = vrot.lane.b32.xlu2 %v648_v37, %s1724_s23 }
 0x621   :  { %v602_v39 = vpop.permute.xlu1 %601 }
 0x622   :  { %v2068_v40 = vadd.f32 %v602_v39, %v594_v38 }
 0x624   :  { %1510 = vtanh.f32 %v2068_v40 }
 0x625   :  { %v651_v42 = vpop.permute.xlu2 %650 }
 0x626   :  { %v653_v43 = vadd.f32 %v651_v42, %v643_v41  ;;  %v278_v42 = vadd.f32 %v1863_v18, %v1856_v16 }
 0x628   :  { %1512 = vtanh.f32 %v653_v43 }
 0x62a   :  { %v1511_v44 = vpop.eup %1510 }
 0x62b   :  { %607 = vrot.lane.b32.xlu0 %v1511_v44, %s1723_s5 }
 0x62e   :  { %v1513_v46 = vpop.eup %1512 }
 0x62f   :  { %656 = vrot.lane.b32.xlu1 %v1513_v46, %s1723_s5 }
 0x69d   :  { %v608_v47 = vpop.permute.xlu0 %607 }
 0x69e   :  { %v610_v48 = vmul.f32 %v608_v47, %v593_v30 }
 0x6a0   :  { %612 = vrot.lane.b32.xlu2 %v610_v48, %s1724_s23 }
 0x6a1   :  { %v657_v49 = vpop.permute.xlu1 %656 }
 0x6a2   :  { %v659_v50 = vmul.f32 %v657_v49, %v642_v17 }
 0x6a4   :  { %683 = vrot.lane.b32.xlu0 %v659_v50, %s1724_s23 }
 0x6fa   :  { %v613_v53 = vpop.permute.xlu2 %612 }
 0x6fb   :  { %616 = vst [vmem:[#allocation2 + $0x1] ss:$8 sm:$0x3] %v613_v53  ;;  %1459 = vmatmul.msk.f32.vlgmr.msrb.gmra.mxu3 %vm370_vm3, %v613_v53 }
 0x6fc   :  { %984 = vmatpush.msrb.mxu3 %v1821_v4 }
 0x6fe   :  { %985 = vmatpush.msrb.mxu3 %v1825_v5 }
 0x700   :  { %986 = vmatpush.msrb.mxu3 %v1838_v10 }
 0x702   :  { %987 = vmatpush.msrb.mxu3 %v1845_v12 }
 0x716   :  { %v684_v54 = vpop.permute.xlu0 %683 }
 0x717   :  { %1460 = vmatmul.msk.f32.vlgmr.msrb.gmra.mxu0 %vm370_vm3, %v684_v54  ;;  %1461 = vmatmul.msk.f32.vlgmr.msrb.gmra.mxu1 %vm370_vm3, %v684_v54 }
 0x718   :  { %1053 = vmatpush.msrb.mxu1 %v1906_v45  ;;  %1028 = vmatpush.msrb.mxu0 %v1919_v52 }
 0x71a   :  { %1054 = vmatpush.msrb.mxu1 %v1917_v51  ;;  %1029 = vmatpush.msrb.mxu0 %v1963_v6 }
 0x71c   :  { %1055 = vmatpush.msrb.mxu1 %v1932_v58  ;;  %1030 = vmatpush.msrb.mxu0 %v1965_v7 }
 0x71e   :  { %1056 = vmatpush.msrb.mxu1 %v1943_v62  ;;  %1031 = vmatpush.msrb.mxu0 %v1972_v9 }
 0x77e   :  { %v679_v56 = vpop.f32.mrf.mxu3 }
 0x794   :  { %v704_v57 = vpop.f32.mrf.mxu0  ;;  %v753_v59 = vpop.f32.mrf.mxu1 }
 0x795   :  { %v705_v60 = vadd.f32 %v704_v57, %v679_v56  ;;  %v756_v61 = vadd.f32 %v753_v59, %v250_v55 }
 0x797   :  { %v707_v63 = vadd.f32 %v2022_v27, %v705_v60  ;;  %v757_v0 = vmul.f32 %v756_v61, %v1866_v21 }
 0x799   :  { %v708_v35 = vmul.f32 %v707_v63, %v1866_v21  ;;  %1514 = vtanh.f32 %v757_v0 }
 0x79b   :  { %1516 = vtanh.f32 %v708_v35 }
 0x79f   :  { %v1515_v1 = vpop.eup %1514 }
 0x7a0   :  { %v759_v2 = vmul.f32 %v1515_v1, %v1866_v21 }
 0x7a1   :  { %v1517_v3 = vpop.eup %1516 }
 0x7a2   :  { %v760_v8 = vadd.f32 %v759_v2, %v1869_v26  ;;  %v710_v19 = vmul.f32 %v1517_v3, %v1866_v21 }
 0x7a4   :  { %763 = vrot.lane.b32.xlu2 %v760_v8, %s1723_s5  ;;  %v711_v11 = vadd.f32 %v710_v19, %v1869_v26  ;;  %v761_v28 = vmul.f32 %v760_v8, %v653_v43 }
 0x7a6   :  { %714 = vrot.lane.b32.xlu1 %v711_v11, %s1723_s5  ;;  %v712_v32 = vmul.f32 %v711_v11, %v2068_v40 }
 0x7fe   :  { %v764_v13 = vpop.permute.xlu2 %763 }
 0x7ff   :  { %v766_v14 = vmul.f32 %v764_v13, %v760_v8 }
 0x801   :  { %768 = vrot.lane.b32.xlu1 %v766_v14, %s1724_s23 }
 0x818   :  { %v715_v24 = vpop.permute.xlu1 %714 }
 0x819   :  { %v717_v25 = vmul.f32 %v715_v24, %v711_v11 }
 0x81b   :  { %719 = vrot.lane.b32.xlu0 %v717_v25, %s1724_s23 }
 0x873   :  { %v769_v29 = vpop.permute.xlu1 %768 }
 0x874   :  { %v771_v30 = vadd.f32 %v769_v29, %v761_v28 }
 0x876   :  { %1518 = vtanh.f32 %v771_v30 }
 0x87c   :  { %v1519_v31 = vpop.eup %1518 }
 0x87d   :  { %774 = vrot.lane.b32.xlu0 %v1519_v31, %s1723_s5 }
 0x88d   :  { %v720_v17 = vpop.permute.xlu0 %719 }
 0x88e   :  { %v722_v33 = vadd.f32 %v720_v17, %v712_v32 }
 0x890   :  { %1520 = vtanh.f32 %v722_v33 }
 0x896   :  { %v1521_v34 = vpop.eup %1520 }
 0x897   :  { %725 = vrot.lane.b32.xlu2 %v1521_v34, %s1723_s5 }
 0x8ef   :  { %v775_v36 = vpop.permute.xlu0 %774 }
 0x8f0   :  { %v777_v37 = vmul.f32 %v775_v36, %v760_v8 }
 0x8f1   :  { %v726_v38 = vpop.permute.xlu2 %725 }
 0x8f2   :  { %v728_v39 = vmul.f32 %v726_v38, %v711_v11  ;;  %801 = vrot.lane.b32.xlu2 %v777_v37, %s1724_s23 }
 0x8f4   :  { %730 = vrot.lane.b32.xlu1 %v728_v39, %s1724_s23 }
 0x94c   :  { %v802_v41 = vpop.permute.xlu2 %801 }
 0x94d   :  { %1463 = vmatmul.msk.f32.vlgmr.msra.gmra.mxu3 %vm370_vm3, %v802_v41  ;;  %1464 = vmatmul.msk.f32.vlgmr.msra.gmra.mxu0 %vm370_vm3, %v802_v41 }
 0x94e   :  { %1171 = vmatpush.msra.mxu0 %v1906_v45  ;;  %1146 = vmatpush.msra.mxu3 %v1919_v52 }
 0x950   :  { %1172 = vmatpush.msra.mxu0 %v1917_v51  ;;  %1147 = vmatpush.msra.mxu3 %v1963_v6 }
 0x952   :  { %1173 = vmatpush.msra.mxu0 %v1932_v58  ;;  %1148 = vmatpush.msra.mxu3 %v1965_v7 }
 0x954   :  { %1174 = vmatpush.msra.mxu0 %v1943_v62  ;;  %1149 = vmatpush.msra.mxu3 %v1972_v9 }
 0x966   :  { %v731_v40 = vpop.permute.xlu1 %730 }
 0x967   :  { %734 = vst [vmem:[#allocation2 + $0x2] ss:$8 sm:$0x3] %v731_v40  ;;  %1462 = vmatmul.msk.f32.vlgmr.msra.gmra.mxu2 %vm370_vm3, %v731_v40 }
 0x968   :  { %1102 = vmatpush.msra.mxu2 %v1821_v4 }
 0x96a   :  { %1103 = vmatpush.msra.mxu2 %v1825_v5 }
 0x96c   :  { %1104 = vmatpush.msra.mxu2 %v1838_v10 }
 0x96e   :  { %1105 = vmatpush.msra.mxu2 %v1845_v12 }
 0x9ca   :  { %v871_v43 = vpop.f32.mrf.mxu0 }
 0x9cb   :  { %v874_v44 = vadd.f32 %v871_v43, %v278_v42 }
 0x9cd   :  { %v875_v46 = vmul.f32 %v874_v44, %v1866_v21 }
 0x9cf   :  { %1522 = vtanh.f32 %v875_v46 }
 0x9d0   :  { %v822_v50 = vpop.f32.mrf.mxu3 }
 0x9d5   :  { %v1523_v47 = vpop.eup %1522 }
 0x9d6   :  { %v877_v48 = vmul.f32 %v1523_v47, %v1866_v21 }
 0x9d8   :  { %v878_v49 = vadd.f32 %v877_v48, %v1869_v26 }
 0x9da   :  { %881 = vrot.lane.b32.xlu0 %v878_v49, %s1723_s5  ;;  %v879_v35 = vmul.f32 %v878_v49, %v771_v30 }
 0x9ea   :  { %v797_v53 = vpop.f32.mrf.mxu2 }
 0x9eb   :  { %v823_v54 = vadd.f32 %v822_v50, %v797_v53 }
 0x9ed   :  { %v825_v55 = vadd.f32 %v2022_v27, %v823_v54  ;;  %v334_v54 = vadd.f32 %v1863_v18, %v2014_v22 }
 0x9ef   :  { %v826_v56 = vmul.f32 %v825_v55, %v1866_v21 }
 0x9f1   :  { %1524 = vtanh.f32 %v826_v56 }
 0x9f7   :  { %v1525_v16 = vpop.eup %1524 }
 0x9f8   :  { %v828_v57 = vmul.f32 %v1525_v16, %v1866_v21 }
 0x9fa   :  { %v829_v59 = vadd.f32 %v828_v57, %v1869_v26 }
 0x9fc   :  { %832 = vrot.lane.b32.xlu1 %v829_v59, %s1723_s5  ;;  %v830_v8 = vmul.f32 %v829_v59, %v722_v33 }
 0xa4c   :  { %v882_v60 = vpop.permute.xlu0 %881 }
 0xa4d   :  { %v884_v61 = vmul.f32 %v882_v60, %v878_v49 }
 0xa4f   :  { %886 = vrot.lane.b32.xlu2 %v884_v61, %s1724_s23 }
 0xa6e   :  { %v833_v63 = vpop.permute.xlu1 %832 }
 0xa6f   :  { %v835_v0 = vmul.f32 %v833_v63, %v829_v59 }
 0xa71   :  { %837 = vrot.lane.b32.xlu0 %v835_v0, %s1724_s23 }
 0xaa9   :  { %v887_v1 = vpop.permute.xlu2 %886 }
 0xaaa   :  { %v889_v2 = vadd.f32 %v887_v1, %v879_v35 }
 0xaac   :  { %1526 = vtanh.f32 %v889_v2 }
 0xab2   :  { %v1527_v3 = vpop.eup %1526 }
 0xab3   :  { %892 = vrot.lane.b32.xlu1 %v1527_v3, %s1723_s5 }
 0xae3   :  { %v838_v19 = vpop.permute.xlu0 %837 }
 0xae4   :  { %v840_v11 = vadd.f32 %v838_v19, %v830_v8 }
 0xae6   :  { %1528 = vtanh.f32 %v840_v11 }
 0xaec   :  { %v1529_v13 = vpop.eup %1528 }
 0xaed   :  { %843 = vrot.lane.b32.xlu2 %v1529_v13, %s1723_s5 }
 0xb25   :  { %v893_v14 = vpop.permute.xlu1 %892 }
 0xb26   :  { %v895_v24 = vmul.f32 %v893_v14, %v878_v49 }
 0xb28   :  { %919 = vrot.lane.b32.xlu0 %v895_v24, %s1724_s23 }
 0xb47   :  { %v844_v25 = vpop.permute.xlu2 %843 }
 0xb48   :  { %v846_v28 = vmul.f32 %v844_v25, %v829_v59 }
 0xb4a   :  { %848 = vrot.lane.b32.xlu1 %v846_v28, %s1724_s23 }
 0xb9a   :  { %v920_v29 = vpop.permute.xlu0 %919 }
 0xb9b   :  { %1466 = vmatmul.msk.f32.vlgmr.msrb.gmra.mxu2 %vm370_vm3, %v920_v29  ;;  %1467 = vmatmul.msk.f32.vlgmr.msrb.gmra.mxu3 %vm370_vm3, %v920_v29 }
 0xb9c   :  { %1289 = vmatpush.msrb.mxu3 %v1906_v45  ;;  %1264 = vmatpush.msrb.mxu2 %v1919_v52  ;;  %v306_v45 = vadd.f32 %v1863_v18, %v2012_v20 }
 0xb9e   :  { %1290 = vmatpush.msrb.mxu3 %v1917_v51  ;;  %1265 = vmatpush.msrb.mxu2 %v1963_v6 }
 0xba0   :  { %1291 = vmatpush.msrb.mxu3 %v1932_v58  ;;  %1266 = vmatpush.msrb.mxu2 %v1965_v7 }
 0xba2   :  { %1292 = vmatpush.msrb.mxu3 %v1943_v62  ;;  %1267 = vmatpush.msrb.mxu2 %v1972_v9 }
 0xbbc   :  { %v849_v30 = vpop.permute.xlu1 %848 }
 0xbbd   :  { %852 = vst [vmem:[#allocation2 + $0x3] ss:$8 sm:$0x3] %v849_v30  ;;  %1465 = vmatmul.msk.f32.vlgmr.msra.gmra.mxu1 %vm370_vm3, %v849_v30 }
 0xbbe   :  { %1220 = vmatpush.msra.mxu1 %v1821_v4 }
 0xbc0   :  { %1221 = vmatpush.msra.mxu1 %v1825_v5 }
 0xbc2   :  { %1222 = vmatpush.msra.mxu1 %v1838_v10 }
 0xbc4   :  { %1223 = vmatpush.msra.mxu1 %v1845_v12 }
 0xc1e   :  { %v989_v51 = vpop.f32.mrf.mxu3  ;;  %v940_v4 = vpop.f32.mrf.mxu2 }
 0xc1f   :  { %v992_v52 = vadd.f32 %v989_v51, %v306_v45 }
 0xc21   :  { %v993_v58 = vmul.f32 %v992_v52, %v1866_v21 }
 0xc23   :  { %1530 = vtanh.f32 %v993_v58 }
 0xc29   :  { %v1531_v62 = vpop.eup %1530 }
 0xc2a   :  { %v995_v6 = vmul.f32 %v1531_v62, %v1866_v21 }
 0xc2c   :  { %v996_v7 = vadd.f32 %v995_v6, %v1869_v26 }
 0xc2e   :  { %999 = vrot.lane.b32.xlu0 %v996_v7, %s1723_s5  ;;  %v997_v37 = vmul.f32 %v996_v7, %v889_v2 }
 0xc3a   :  { %v915_v5 = vpop.f32.mrf.mxu1 }
 0xc3b   :  { %v941_v10 = vadd.f32 %v940_v4, %v915_v5  ;;  %v362_v5 = vadd.f32 %v1863_v18, %v2016_v23 }
 0xc3d   :  { %v943_v12 = vadd.f32 %v2022_v27, %v941_v10 }
 0xc3f   :  { %v944_v9 = vmul.f32 %v943_v12, %v1866_v21 }
 0xc41   :  { %1532 = vtanh.f32 %v944_v9 }
 0xc47   :  { %v1533_v20 = vpop.eup %1532 }
 0xc48   :  { %v946_v31 = vmul.f32 %v1533_v20, %v1866_v21 }
 0xc4a   :  { %v947_v32 = vadd.f32 %v946_v31, %v1869_v26 }
 0xc4c   :  { %950 = vrot.lane.b32.xlu2 %v947_v32, %s1723_s5  ;;  %v948_v40 = vmul.f32 %v947_v32, %v840_v11 }
 0xca0   :  { %v1000_v17 = vpop.permute.xlu0 %999 }
 0xca1   :  { %v1002_v33 = vmul.f32 %v1000_v17, %v996_v7 }
 0xca3   :  { %1004 = vrot.lane.b32.xlu2 %v1002_v33, %s1724_s23 }
 0xca6   :  { %v951_v34 = vpop.permute.xlu2 %950 }
 0xca7   :  { %v953_v36 = vmul.f32 %v951_v34, %v947_v32 }
 0xca9   :  { %955 = vrot.lane.b32.xlu1 %v953_v36, %s1724_s23 }
 0xcfd   :  { %v1005_v38 = vpop.permute.xlu2 %1004 }
 0xcfe   :  { %v1007_v39 = vadd.f32 %v1005_v38, %v997_v37 }
 0xd00   :  { %1534 = vtanh.f32 %v1007_v39 }
 0xd06   :  { %v1535_v41 = vpop.eup %1534 }
 0xd07   :  { %1010 = vrot.lane.b32.xlu1 %v1535_v41, %s1723_s5 }
 0xd1b   :  { %v956_v42 = vpop.permute.xlu1 %955 }
 0xd1c   :  { %v958_v43 = vadd.f32 %v956_v42, %v948_v40 }
 0xd1e   :  { %1536 = vtanh.f32 %v958_v43 }
 0xd24   :  { %v1537_v44 = vpop.eup %1536 }
 0xd25   :  { %961 = vrot.lane.b32.xlu0 %v1537_v44, %s1723_s5 }
 0xd79   :  { %v1011_v46 = vpop.permute.xlu1 %1010 }
 0xd7a   :  { %v1013_v47 = vmul.f32 %v1011_v46, %v996_v7 }
 0xd7c   :  { %1037 = vrot.lane.b32.xlu0 %v1013_v47, %s1724_s23 }
 0xd97   :  { %v962_v48 = vpop.permute.xlu0 %961 }
 0xd98   :  { %v964_v49 = vmul.f32 %v962_v48, %v947_v32 }
 0xd9a   :  { %966 = vrot.lane.b32.xlu2 %v964_v49, %s1724_s23 }
 0xdee   :  { %v1038_v50 = vpop.permute.xlu0 %1037 }
 0xdef   :  { %1469 = vmatmul.msk.f32.vlgmr.msrb.gmra.mxu1 %vm370_vm3, %v1038_v50  ;;  %1470 = vmatmul.msk.f32.vlgmr.msra.gmra.mxu2 %vm370_vm3, %v1038_v50 }
 0xdf4   :  { %v967_v53 = vpop.permute.xlu2 %966 }
 0xdf5   :  { %970 = vst [vmem:[#allocation2 + $0x4] ss:$8 sm:$0x3] %v967_v53  ;;  %1468 = vmatmul.msk.f32.vlgmr.msrb.gmra.mxu0 %vm370_vm3, %v967_v53 }
 0xe6c   :  { %v1058_v55 = vpop.f32.mrf.mxu1 }
 0xe72   :  { %v1033_v56 = vpop.f32.mrf.mxu0  ;;  %v1107_v16 = vpop.f32.mrf.mxu2 }
 0xe73   :  { %v1059_v57 = vadd.f32 %v1058_v55, %v1033_v56  ;;  %v1110_v59 = vadd.f32 %v1107_v16, %v334_v54 }
 0xe75   :  { %v1061_v60 = vadd.f32 %v2022_v27, %v1059_v57  ;;  %v1111_v61 = vmul.f32 %v1110_v59, %v1866_v21 }
 0xe77   :  { %v1062_v63 = vmul.f32 %v1061_v60, %v1866_v21  ;;  %1538 = vtanh.f32 %v1111_v61 }
 0xe79   :  { %1540 = vtanh.f32 %v1062_v63 }
 0xe7d   :  { %v1539_v0 = vpop.eup %1538 }
 0xe7e   :  { %v1113_v35 = vmul.f32 %v1539_v0, %v1866_v21 }
 0xe7f   :  { %v1541_v1 = vpop.eup %1540 }
 0xe80   :  { %v1114_v2 = vadd.f32 %v1113_v35, %v1869_v26  ;;  %v1064_v22 = vmul.f32 %v1541_v1, %v1866_v21 }
 0xe82   :  { %1117 = vrot.lane.b32.xlu2 %v1114_v2, %s1723_s5  ;;  %v1065_v3 = vadd.f32 %v1064_v22, %v1869_v26  ;;  %v1115_v14 = vmul.f32 %v1114_v2, %v1007_v39 }
 0xe84   :  { %1068 = vrot.lane.b32.xlu1 %v1065_v3, %s1723_s5  ;;  %v1066_v29 = vmul.f32 %v1065_v3, %v958_v43 }
 0xedc   :  { %v1118_v8 = vpop.permute.xlu2 %1117 }
 0xedd   :  { %v1120_v19 = vmul.f32 %v1118_v8, %v1114_v2 }
 0xedf   :  { %1122 = vrot.lane.b32.xlu1 %v1120_v19, %s1724_s23 }
 0xef6   :  { %v1069_v11 = vpop.permute.xlu1 %1068 }
 0xef7   :  { %v1071_v13 = vmul.f32 %v1069_v11, %v1065_v3 }
 0xef9   :  { %1073 = vrot.lane.b32.xlu0 %v1071_v13, %s1724_s23 }
 0xf51   :  { %v1123_v24 = vpop.permute.xlu1 %1122 }
 0xf52   :  { %v1125_v25 = vadd.f32 %v1123_v24, %v1115_v14 }
 0xf54   :  { %1542 = vtanh.f32 %v1125_v25 }
 0xf5a   :  { %v1543_v28 = vpop.eup %1542 }
 0xf5b   :  { %1128 = vrot.lane.b32.xlu0 %v1543_v28, %s1723_s5  ;;  %v1344_v28 = vld [vmem:[#allocation9 + $0x10] sm:$0xff] }
 0xf6b   :  { %v1074_v30 = vpop.permute.xlu0 %1073 }
 0xf6c   :  { %v1076_v45 = vadd.f32 %v1074_v30, %v1066_v29  ;;  %v1343_v29 = vld [vmem:[#allocation9 + $0x8] sm:$0xff]  ;;  %v1342_v30 = vld [vmem:[#allocation9] sm:$0xff] }
 0xf6e   :  { %1544 = vtanh.f32 %v1076_v45 }
 0xf74   :  { %v1545_v51 = vpop.eup %1544 }
 0xf75   :  { %1079 = vrot.lane.b32.xlu2 %v1545_v51, %s1723_s5 }
 0xfcd   :  { %v1129_v52 = vpop.permute.xlu0 %1128 }
 0xfce   :  { %v1131_v58 = vmul.f32 %v1129_v52, %v1114_v2 }
 0xfcf   :  { %v1080_v62 = vpop.permute.xlu2 %1079 }
 0xfd0   :  { %v1082_v6 = vmul.f32 %v1080_v62, %v1065_v3  ;;  %1155 = vrot.lane.b32.xlu2 %v1131_v58, %s1724_s23  ;;  %v1493_v58 = vld [vmem:[%s2259_s10] ss:$0 sm:$0xff] }
 0xfd2   :  { %1084 = vrot.lane.b32.xlu1 %v1082_v6, %s1724_s23 }
0x102a   :  { %v1156_v7 = vpop.permute.xlu2 %1155 }
0x102b   :  { %1472 = vmatmul.msk.f32.vlgmr.msra.gmra.mxu0 %vm370_vm3, %v1156_v7  ;;  %1473 = vmatmul.msk.f32.vlgmr.msra.gmra.mxu1 %vm370_vm3, %v1156_v7 }
0x1044   :  { %v1085_v4 = vpop.permute.xlu1 %1084 }
0x1045   :  { %1088 = vst [vmem:[#allocation2 + $0x5] ss:$8 sm:$0x3] %v1085_v4  ;;  %1471 = vmatmul.msk.f32.vlgmr.msra.gmra.mxu3 %vm370_vm3, %v1085_v4 }
0x10a8   :  { %v1225_v10 = vpop.f32.mrf.mxu1  ;;  %v1176_v17 = vpop.f32.mrf.mxu0 }
0x10a9   :  { %v1228_v12 = vadd.f32 %v1225_v10, %v362_v5 }
0x10ab   :  { %v1229_v9 = vmul.f32 %v1228_v12, %v1866_v21 }
0x10ad   :  { %1546 = vtanh.f32 %v1229_v9 }
0x10b3   :  { %v1547_v20 = vpop.eup %1546 }
0x10b4   :  { %v1231_v31 = vmul.f32 %v1547_v20, %v1866_v21 }
0x10b6   :  { %v1232_v32 = vadd.f32 %v1231_v31, %v1869_v26 }
0x10b8   :  { %1235 = vrot.lane.b32.xlu1 %v1232_v32, %s1723_s5  ;;  %v1233_v43 = vmul.f32 %v1232_v32, %v1125_v25  ;;  %v1345_v25 = vld [vmem:[#allocation9 + $0x18] sm:$0xff] }
0x10b9   :  { %1370 = vmatpush.msrb.mxu0 %v1345_v25 }
0x10bb   :  { %1371 = vmatpush.msrb.mxu0 %v1344_v28 }
0x10bd   :  { %1372 = vmatpush.msrb.mxu0 %v1343_v29 }
0x10bf   :  { %1373 = vmatpush.msrb.mxu0 %v1342_v30 }
0x10c8   :  { %v1151_v33 = vpop.f32.mrf.mxu3 }
0x10c9   :  { %v1177_v34 = vadd.f32 %v1176_v17, %v1151_v33 }
0x10cb   :  { %v1179_v36 = vadd.f32 %v2022_v27, %v1177_v34 }
0x10cd   :  { %v1180_v37 = vmul.f32 %v1179_v36, %v1866_v21 }
0x10cf   :  { %1548 = vtanh.f32 %v1180_v37 }
0x10d5   :  { %v1549_v18 = vpop.eup %1548 }
0x10d6   :  { %v1182_v23 = vmul.f32 %v1549_v18, %v1866_v21 }
0x10d8   :  { %v1183_v38 = vadd.f32 %v1182_v23, %v1869_v26 }
0x10da   :  { %1186 = vrot.lane.b32.xlu0 %v1183_v38, %s1723_s5  ;;  %v1184_v48 = vmul.f32 %v1183_v38, %v1076_v45 }
0x112a   :  { %v1236_v39 = vpop.permute.xlu1 %1235 }
0x112b   :  { %v1238_v41 = vmul.f32 %v1236_v39, %v1232_v32 }
0x112d   :  { %1240 = vrot.lane.b32.xlu0 %v1238_v41, %s1724_s23 }
0x114c   :  { %v1187_v40 = vpop.permute.xlu0 %1186 }
0x114d   :  { %v1189_v42 = vmul.f32 %v1187_v40, %v1183_v38 }
0x114f   :  { %1191 = vrot.lane.b32.xlu2 %v1189_v42, %s1724_s23 }
0x119f   :  { %v1241_v44 = vpop.permute.xlu0 %1240 }
0x11a0   :  { %v1243_v46 = vadd.f32 %v1241_v44, %v1233_v43 }
0x11a2   :  { %1550 = vtanh.f32 %v1243_v46 }
0x11a8   :  { %v1551_v47 = vpop.eup %1550 }
0x11a9   :  { %v1192_v49 = vpop.permute.xlu2 %1191  ;;  %1246 = vrot.lane.b32.xlu2 %v1551_v47, %s1723_s5 }
0x11aa   :  { %v1194_v50 = vadd.f32 %v1192_v49, %v1184_v48 }
0x11ac   :  { %1552 = vtanh.f32 %v1194_v50 }
0x11b2   :  { %v1553_v53 = vpop.eup %1552 }
0x11b3   :  { %1197 = vrot.lane.b32.xlu1 %v1553_v53, %s1723_s5 }
0x1203   :  { %v1247_v54 = vpop.permute.xlu2 %1246 }
0x1204   :  { %v1249_v55 = vmul.f32 %v1247_v54, %v1232_v32 }
0x1206   :  { %1273 = vrot.lane.b32.xlu1 %v1249_v55, %s1724_s23 }
0x1225   :  { %v1198_v56 = vpop.permute.xlu1 %1197 }
0x1226   :  { %v1200_v16 = vmul.f32 %v1198_v56, %v1183_v38 }
0x1228   :  { %1202 = vrot.lane.b32.xlu0 %v1200_v16, %s1724_s23 }
0x1278   :  { %v1274_v57 = vpop.permute.xlu1 %1273 }
0x1279   :  { %1328 = vst.msk [vmem:[#allocation11] sm:$0x3] %vm1327_vm7, %v1274_v57  ;;  %1475 = vmatmul.msk.f32.vlgmr.msrb.gmra.mxu3 %vm370_vm3, %v1274_v57 }
0x129a   :  { %v1203_v59 = vpop.permute.xlu0 %1202 }
0x129b   :  { %1206 = vst [vmem:[#allocation2 + $0x6] ss:$8 sm:$0x3] %v1203_v59  ;;  %1474 = vmatmul.msk.f32.vlgmr.msrb.gmra.mxu2 %vm370_vm3, %v1203_v59 }
0x12fc   :  { %v1294_v60 = vpop.f32.mrf.mxu3 }
0x131e   :  { %v1269_v61 = vpop.f32.mrf.mxu2 }
0x131f   :  { %v1295_v63 = vadd.f32 %v1294_v60, %v1269_v61 }
0x1321   :  { %v1297_v0 = vadd.f32 %v2022_v27, %v1295_v63 }
0x1323   :  { %v1298_v35 = vmul.f32 %v1297_v0, %v1866_v21 }
0x1325   :  { %1554 = vtanh.f32 %v1298_v35 }
0x132b   :  { %v1555_v1 = vpop.eup %1554 }
0x132c   :  { %v1300_v2 = vmul.f32 %v1555_v1, %v1866_v21 }
0x132e   :  { %v1301_v22 = vadd.f32 %v1300_v2, %v1869_v26 }
0x1330   :  { %1304 = vrot.lane.b32.xlu2 %v1301_v22, %s1723_s5  ;;  %v1302_v19 = vmul.f32 %v1301_v22, %v1194_v50 }
0x138a   :  { %v1305_v3 = vpop.permute.xlu2 %1304 }
0x138b   :  { %v1307_v8 = vmul.f32 %v1305_v3, %v1301_v22 }
0x138d   :  { %1309 = vrot.lane.b32.xlu0 %v1307_v8, %s1724_s23 }
0x1395   :  { %1330 = vrot.lane.b32.xlu0 %v1243_v46, %s1725_s8 }
0x13ff   :  { %v1310_v11 = vpop.permute.xlu0 %1309 }
0x1400   :  { %v1312_v13 = vadd.f32 %v1310_v11, %v1302_v19 }
0x1402   :  { %1556 = vtanh.f32 %v1312_v13 }
0x1407   :  { %v1331_v27 = vpop.permute.xlu0 %1330 }
0x1408   :  { %v1557_v14 = vpop.eup %1556  ;;  %1333 = vst.msk [vmem:[#allocation12] sm:$0x3] %vm1327_vm7, %v1331_v27 }
0x1409   :  { %1315 = vrot.lane.b32.xlu1 %v1557_v14, %s1723_s5  ;;  %s1726_s5 = smov [#allocation11]  }
0x140a   :  { %s1397_s28 = sshll.u32 %s1726_s5, 4  ;;  %s1398_s28 = int_to_ptr.vmem [resolvable:$true] %s1397_s28 }
0x1411   :  { %1337 = vrot.lane.b32.xlu1 %v1312_v13, %s1725_s8 }
0x147b   :  { %v1316_v21 = vpop.permute.xlu1 %1315 }
0x147c   :  { %v1318_v26 = vmul.f32 %v1316_v21, %v1301_v22 }
0x147e   :  { %1320 = vrot.lane.b32.xlu2 %v1318_v26, %s1724_s23 }
0x1483   :  { %v1338_v24 = vpop.permute.xlu1 %1337 }
0x1484   :  { %1341 = vst.msk [vmem:[#allocation12 + $0x2] sm:$0x3] %vm1327_vm7, %v1338_v24 }
0x1485   :  { %1418 = dma.vmem_to_hbm [thread:$0]  %s1411_s3, 64, %s1413_s18, [#allocation13], %s1724_s23, %s1724_s23, %s1728_s15  }
0x14d8   :  { %v1321_v45 = vpop.permute.xlu2 %1320 }
0x14d9   :  { %1324 = vst [vmem:[#allocation2 + $0x7] ss:$8 sm:$0x3] %v1321_v45 }
0x14da   :  { %1335 = vst.msk [vmem:[#allocation11 + $0x2] sm:$0x3] %vm1327_vm7, %v1321_v45 }
0x14db   :  { %1405 = dma.vmem_to_hbm [thread:$0]  %s1398_s28, 64, %s1400_s30, [#allocation5], %s1724_s23, %s1724_s23, %s1728_s15  }
0x14e0   :  { %v1347_v51 = vld [vmem:[#allocation2] sm:$0xff]  ;;  %v1348_v52 = vld [vmem:[#allocation2 + $0x8] sm:$0xff] }
0x14e1   :  { %1476 = vmatmul.msk.f32.vlgmr.msrb.gmra.mxu0 %vm370_vm3, %v1347_v51 }
0x14e9   :  { %1477 = vmatmul.msk.f32.gmra.mxu0 %vm370_vm3, %v1348_v52 }
0x155e   :  { %v1375_v62 = vpop.f32.mrf.mxu0 }
0x155f   :  { %v1376_v6 = vadd.f32 %v1493_v58, %v1375_v62 }
0x1561   :  { %1558 = vtanh.f32 %v1376_v6 }
0x1566   :  { %v1378_v7 = vpop.f32.mrf.mxu0 }
0x1567   :  { %v1559_v4 = vpop.eup %1558  ;;  %v1379_v5 = vadd.f32 %v1493_v58, %v1378_v7 }
0x1568   :  { %v1386_v10 = vsel %vm1383_vm10, %v1559_v4, %v1376_v6 }
0x1569   :  { %1389 = vst.msk [vmem:[%s2260_s11] sm:$0xff] %vm1388_vm11, %v1386_v10  ;;  %1560 = vtanh.f32 %v1379_v5 }
0x156f   :  { %v1561_v12 = vpop.eup %1560 }
0x1570   :  { %v1387_v9 = vsel %vm1383_vm10, %v1561_v12, %v1379_v5 }
0x1571   :  { %1390 = vst.msk [vmem:[%s2260_s11 + $0x8] sm:$0xff] %vm1388_vm11, %v1387_v9 }
0x1572   :  { %1712 = dma.done.wait [#allocation5], 64  }
0x1573   :  { %1713 = vsyncadd [#allocation5], 4294967232 }
0x1574   :  { %1714 = dma.done.wait [#allocation13], 64  }
0x1575   :  { %1715 = vsyncadd [#allocation13], 4294967232 }
0x1576   :  { %1429 = vsyncpa [#allocation4], 1 }
0x1577   :  { %1430 = vsyncpa [#allocation7], 1 }
0x1578   :  { %1431 = vsyncpa [#allocation10], 1 }
0x1579   :  { %1432 = vsyncpa [#allocation5], 1 }
0x157a   :  { %1433 = vsyncpa [#allocation13], 1 }

</bundles_post_ra>
